<compile_context>
chip_gen: v6e
topology: v6e:2x2x1
jax: 0.10.0
libtpu: 0.0.40
codegen_flags: <defaults>
</compile_context>

<pallas_src>
import functools

import jax
import jax.numpy as jnp
from jax.experimental import pallas as pl
from jax.experimental.pallas import tpu as pltpu

LN_EPS = 1e-6                    # PyTorch LayerNorm(eps=1e-6) used by Block
WEIGHT_DTYPE = jnp.bfloat16      # weights shipped/used on the MXU in bf16


# ----------------------------------------------------------------------------
# small math helpers (Mosaic-safe)
# ----------------------------------------------------------------------------
def _erf(z):
    # Abramowitz & Stegun 7.1.26 rational approximation (|err| < 1.5e-7).
    # Matches PyTorch's exact (erf-based) F.gelu within test tolerance.
    p = 0.3275911
    a1, a2, a3, a4, a5 = (0.254829592, -0.284496736, 1.421413741,
                          -1.453152027, 1.061405429)
    sgn = jnp.where(z >= 0.0, 1.0, -1.0)
    az = jnp.abs(z)
    t = 1.0 / (1.0 + p * az)
    poly = t * (a1 + t * (a2 + t * (a3 + t * (a4 + t * a5))))
    return sgn * (1.0 - poly * jnp.exp(-az * az))


def _gelu_exact(x):
    return 0.5 * x * (1.0 + _erf(x * 0.7071067811865476))


def _layer_norm(x, gamma, beta):
    mu = jnp.mean(x, axis=-1, keepdims=True)
    xc = x - mu
    var = jnp.mean(xc * xc, axis=-1, keepdims=True)
    return xc * jax.lax.rsqrt(var + LN_EPS) * gamma + beta


# ----------------------------------------------------------------------------
# fused Block kernel: TB batch elements (TB*S rows) per grid step
# ----------------------------------------------------------------------------
def _block_kernel(x_ref, ln1g_ref, ln1b_ref, wqkv_ref, bqkv_ref, wo_ref, bo_ref,
                  ln2g_ref, ln2b_ref, w1_ref, b1_ref, w2_ref, b2_ref,
                  out_ref, ctx_ref, *, tb, seq, heads, dim_head):
    x = x_ref[...]                              # (TB*S, H) f32
    R = tb * seq
    A = heads * dim_head
    dh = dim_head

    # ---- LayerNorm 1 (attention_norm) over all rows in the block ----
    y = _layer_norm(x, ln1g_ref[...], ln1b_ref[...])

    # ---- fused QKV projection: one wide matmul (M=TB*S, K=H, N=3A) ----
    # 1/sqrt(dim_head) is already folded into the Q columns of wqkv / bqkv.
    qkv = jnp.dot(y.astype(WEIGHT_DTYPE), wqkv_ref[...],
                  preferred_element_type=jnp.float32) + bqkv_ref[...]   # (R, 3A)

    # ---- multi-head attention (heads statically unrolled; TB batched) ----
    for h in range(heads):
        qh = qkv[:, h * dh:(h + 1) * dh].reshape(tb, seq, dh)
        kh = qkv[:, A + h * dh:A + (h + 1) * dh].reshape(tb, seq, dh)
        vh = qkv[:, 2 * A + h * dh:2 * A + (h + 1) * dh].reshape(tb, seq, dh)
        s = jnp.einsum("bqd,bkd->bqk", qh, kh,
                       preferred_element_type=jnp.float32)     # (TB, S, S)
        m = jnp.max(s, axis=-1, keepdims=True)
        e = jnp.exp(s - m)
        p = e * pl.reciprocal(jnp.sum(e, axis=-1, keepdims=True), approx=True)
        ctx = jnp.einsum("bqk,bkd->bqd", p, vh,
                         preferred_element_type=jnp.float32)   # (TB, S, dh)
        ctx_ref[:, h * dh:(h + 1) * dh] = ctx.reshape(R, dh)

    # ---- single wide output projection: (R, A) @ (A, H), K = 512 ----
    attn_out = jnp.dot(ctx_ref[...].astype(WEIGHT_DTYPE), wo_ref[...],
                       preferred_element_type=jnp.float32) + bo_ref[...]
    x = x + attn_out                            # residual 1 (drop_path = Identity)

    # ---- LayerNorm 2 (ffn_norm) + MLP ----
    y2 = _layer_norm(x, ln2g_ref[...], ln2b_ref[...])
    h1 = jnp.dot(y2.astype(WEIGHT_DTYPE), w1_ref[...],
                 preferred_element_type=jnp.float32) + b1_ref[...]
    h1 = _gelu_exact(h1)
    h2 = jnp.dot(h1.astype(WEIGHT_DTYPE), w2_ref[...],
                 preferred_element_type=jnp.float32) + b2_ref[...]

    out_ref[...] = (x + h2).astype(out_ref.dtype)   # residual 2


def _choose_tb(B, S, target_rows=256):
    """Batch elements per grid step: ~target_rows MXU rows, >=2 grid steps,
    and an exact divisor of B."""
    cap = max(1, target_rows // max(S, 1))
    if B >= 2:
        cap = min(cap, B // 2)       # keep both v7x TensorCores busy
    cap = max(1, min(cap, B))
    tb = 1
    for cand in range(1, cap + 1):
        if B % cand == 0:
            tb = cand
    return tb


def _pinned_spec(shape):
    """Constant-index (pinned) weight spec; single-buffered when supported."""
    idx = lambda i: (0, 0)
    if hasattr(pl, "Buffered"):
        try:
            return pl.BlockSpec(shape, idx, pipeline_mode=pl.Buffered(1))
        except TypeError:
            pass
    return pl.BlockSpec(shape, idx)


def block_forward(params, x):
    """Block.forward(x) for x of shape (B, S, hidden)."""
    B, S, H = x.shape
    heads, dim_head = params["heads"], params["dim_head"]
    A = heads * dim_head

    # Fold 1/sqrt(dim_head) into the Q columns (weights in f32, then bf16 cast).
    scale = 1.0 / (dim_head ** 0.5)
    wqkv = params["wqkv"].at[:, :A].multiply(scale).astype(WEIGHT_DTYPE)
    bqkv = params["bqkv"].at[:, :A].multiply(scale)            # bias stays f32
    wo = params["wo"].astype(WEIGHT_DTYPE)
    w1 = params["w1"].astype(WEIGHT_DTYPE)
    w2 = params["w2"].astype(WEIGHT_DTYPE)

    weights = (params["ln1_g"], params["ln1_b"],
               wqkv, bqkv,
               wo, params["bo"],
               params["ln2_g"], params["ln2_b"],
               w1, params["b1"],
               w2, params["b2"])

    TB = _choose_tb(B, S)
    rows = TB * S

    xr = x.reshape(B * S, H)                       # flatten batch into MXU rows
    x_spec = pl.BlockSpec((rows, H), lambda i: (i, 0))
    out_spec = pl.BlockSpec((rows, H), lambda i: (i, 0))
    pinned = [_pinned_spec(w.shape) for w in weights]

    kernel = functools.partial(_block_kernel, tb=TB, seq=S,
                               heads=heads, dim_head=dim_head)

    out_flat = pl.pallas_call(
        kernel,
        out_shape=jax.ShapeDtypeStruct((B * S, H), jnp.float32),
        grid_spec=pltpu.PrefetchScalarGridSpec(
            num_scalar_prefetch=0,
            grid=(B // TB,),
            in_specs=[x_spec] + pinned,
            out_specs=out_spec,
            scratch_shapes=[pltpu.VMEM((rows, A), jnp.float32)],   # ctx slab
        ),
        compiler_params=pltpu.CompilerParams(
            dimension_semantics=("parallel",),     # megacore split on v7x
            vmem_limit_bytes=48 * 1024 * 1024,     # < 64 MiB physical on v7x
        ),
    )(xr, *weights)
    return out_flat.reshape(B, S, H)


# ----------------------------------------------------------------------------
# parameter init (matches nn.Linear / nn.LayerNorm defaults) + pure-JAX reference
# ----------------------------------------------------------------------------
def init_block_params(key, hidden, heads=8, dim_head=64, mlp_mult=4):
    A = heads * dim_head
    Hm = mlp_mult * hidden
    ks = jax.random.split(key, 6)

    def linear(k, cin, cout):
        bound = 1.0 / (cin ** 0.5)
        kw, kb = jax.random.split(k)
        w = jax.random.uniform(kw, (cin, cout), jnp.float32, -bound, bound)
        b = jax.random.uniform(kb, (cout,), jnp.float32, -bound, bound)
        return w, b

    wq, bq = linear(ks[0], hidden, A)
    wk, bk = linear(ks[1], hidden, A)
    wv, bv = linear(ks[2], hidden, A)
    wo, bo = linear(ks[3], A, hidden)
    w1, b1 = linear(ks[4], hidden, Hm)
    w2, b2 = linear(ks[5], Hm, hidden)

    return dict(
        heads=heads, dim_head=dim_head,
        ln1_g=jnp.ones((1, hidden), jnp.float32),
        ln1_b=jnp.zeros((1, hidden), jnp.float32),
        wqkv=jnp.concatenate([wq, wk, wv], axis=1),          # (H, 3A)
        bqkv=jnp.concatenate([bq, bk, bv]).reshape(1, 3 * A),
        wo=wo, bo=bo.reshape(1, hidden),
        ln2_g=jnp.ones((1, hidden), jnp.float32),
        ln2_b=jnp.zeros((1, hidden), jnp.float32),
        w1=w1, b1=b1.reshape(1, Hm),
        w2=w2, b2=b2.reshape(1, hidden),
    )


def block_forward_reference(params, x):
    heads, dim_head = params["heads"], params["dim_head"]
    A = heads * dim_head
    hi = jax.lax.Precision.HIGHEST

    def ln(v, g, b):
        mu = jnp.mean(v, axis=-1, keepdims=True)
        var = jnp.mean((v - mu) ** 2, axis=-1, keepdims=True)
        return (v - mu) * jax.lax.rsqrt(var + LN_EPS) * g + b

    B, S, _ = x.shape
    y = ln(x, params["ln1_g"], params["ln1_b"])
    qkv = jnp.einsum("bsh,ha->bsa", y, params["wqkv"], precision=hi) + params["bqkv"]
    q, k, v = jnp.split(qkv, 3, axis=-1)
    q = q.reshape(B, S, heads, dim_head).transpose(0, 2, 1, 3)
    k = k.reshape(B, S, heads, dim_head).transpose(0, 2, 1, 3)
    v = v.reshape(B, S, heads, dim_head).transpose(0, 2, 1, 3)
    s = jnp.einsum("bhqd,bhkd->bhqk", q, k, precision=hi) / (dim_head ** 0.5)
    p = jax.nn.softmax(s, axis=-1)
    ctx = jnp.einsum("bhqk,bhkd->bhqd", p, v, precision=hi)
    ctx = ctx.transpose(0, 2, 1, 3).reshape(B, S, A)
    attn_out = jnp.einsum("bsa,ah->bsh", ctx, params["wo"], precision=hi) + params["bo"]
    x = x + attn_out
    y2 = ln(x, params["ln2_g"], params["ln2_b"])
    h1 = jnp.einsum("bsh,hm->bsm", y2, params["w1"], precision=hi) + params["b1"]
    h1 = jax.nn.gelu(h1, approximate=False)
    h2 = jnp.einsum("bsm,mh->bsh", h1, params["w2"], precision=hi) + params["b2"]
    return x + h2


if __name__ == "__main__":
    key = jax.random.PRNGKey(0)
    B, S, H = 2, 8, 32                 # batch, seq, hidden_size
    heads, dim_head = 8, 64            # Attention defaults in the PyTorch module

    kx, kp = jax.random.split(key)
    x = jax.random.normal(kx, (B, S, H), jnp.float32)
    params = init_block_params(kp, H, heads=heads, dim_head=dim_head)

    out = block_forward(params, x)
    out = jax.block_until_ready(out)

    assert out.shape == (B, S, H)
    assert bool(jnp.all(jnp.isfinite(out)))

    ref = block_forward_reference(params, x)
    max_err = float(jnp.max(jnp.abs(out - ref)))
    assert max_err < 2e-2, f"mismatch vs reference: {max_err}"

    print("KERNEL_OK")
</pallas_src>

<mosaic_0001>
module attributes {stable_mosaic.version = 11 : i64} {
  func.func @_block_kernel(%arg0: i32, %arg1: memref<8x32xf32, #tpu.memory_space<vmem>>, %arg2: memref<1x32xf32, #tpu.memory_space<vmem>>, %arg3: memref<1x32xf32, #tpu.memory_space<vmem>>, %arg4: memref<32x1536xbf16, #tpu.memory_space<vmem>>, %arg5: memref<1x1536xf32, #tpu.memory_space<vmem>>, %arg6: memref<512x32xbf16, #tpu.memory_space<vmem>>, %arg7: memref<1x32xf32, #tpu.memory_space<vmem>>, %arg8: memref<1x32xf32, #tpu.memory_space<vmem>>, %arg9: memref<1x32xf32, #tpu.memory_space<vmem>>, %arg10: memref<32x128xbf16, #tpu.memory_space<vmem>>, %arg11: memref<1x128xf32, #tpu.memory_space<vmem>>, %arg12: memref<128x32xbf16, #tpu.memory_space<vmem>>, %arg13: memref<1x32xf32, #tpu.memory_space<vmem>>, %arg14: memref<8x32xf32, #tpu.memory_space<vmem>>, %arg15: memref<8x512xf32, #tpu.memory_space<vmem>>) attributes {dimension_semantics = [#tpu.dimension_semantics<parallel>], iteration_bounds = array<i64: 2>, scalar_prefetch = 0 : i64, scratch_operands = 1 : i64, tpu.core_type = #tpu.core_type<tc>, window_params = [{transform_indices = @transform_0, window_bounds = array<i64: 8, 32>}, {pipeline_mode = #tpu.pipeline_mode<synchronous>, transform_indices = @transform_1, window_bounds = array<i64: 1, 32>}, {pipeline_mode = #tpu.pipeline_mode<synchronous>, transform_indices = @transform_2, window_bounds = array<i64: 1, 32>}, {pipeline_mode = #tpu.pipeline_mode<synchronous>, transform_indices = @transform_3, window_bounds = array<i64: 32, 1536>}, {pipeline_mode = #tpu.pipeline_mode<synchronous>, transform_indices = @transform_4, window_bounds = array<i64: 1, 1536>}, {pipeline_mode = #tpu.pipeline_mode<synchronous>, transform_indices = @transform_5, window_bounds = array<i64: 512, 32>}, {pipeline_mode = #tpu.pipeline_mode<synchronous>, transform_indices = @transform_6, window_bounds = array<i64: 1, 32>}, {pipeline_mode = #tpu.pipeline_mode<synchronous>, transform_indices = @transform_7, window_bounds = array<i64: 1, 32>}, {pipeline_mode = #tpu.pipeline_mode<synchronous>, transform_indices = @transform_8, window_bounds = array<i64: 1, 32>}, {pipeline_mode = #tpu.pipeline_mode<synchronous>, transform_indices = @transform_9, window_bounds = array<i64: 32, 128>}, {pipeline_mode = #tpu.pipeline_mode<synchronous>, transform_indices = @transform_10, window_bounds = array<i64: 1, 128>}, {pipeline_mode = #tpu.pipeline_mode<synchronous>, transform_indices = @transform_11, window_bounds = array<i64: 128, 32>}, {pipeline_mode = #tpu.pipeline_mode<synchronous>, transform_indices = @transform_12, window_bounds = array<i64: 1, 32>}, {transform_indices = @transform_13, window_bounds = array<i64: 8, 32>}]} {
    %c0 = arith.constant 0 : index
    %c0_0 = arith.constant 0 : index
    %0 = vector.load %arg1[%c0, %c0_0] : memref<8x32xf32, #tpu.memory_space<vmem>>, vector<8x32xf32>
    %c0_1 = arith.constant 0 : index
    %c0_2 = arith.constant 0 : index
    %1 = vector.load %arg2[%c0_1, %c0_2] : memref<1x32xf32, #tpu.memory_space<vmem>>, vector<1x32xf32>
    %c0_3 = arith.constant 0 : index
    %c0_4 = arith.constant 0 : index
    %2 = vector.load %arg3[%c0_3, %c0_4] : memref<1x32xf32, #tpu.memory_space<vmem>>, vector<1x32xf32>
    %cst = arith.constant dense<0.000000e+00> : vector<8xf32>
    %3 = vector.multi_reduction <add>, %0, %cst [1] : vector<8x32xf32> to vector<8xf32>
    %4 = vector.shape_cast %3 : vector<8xf32> to vector<8x1xf32>
    %cst_5 = arith.constant 3.200000e+01 : f32
    %5 = vector.broadcast %cst_5 : f32 to vector<8x1xf32>
    %6 = arith.divf %4, %5 : vector<8x1xf32>
    %7 = vector.broadcast %6 : vector<8x1xf32> to vector<8x32xf32>
    %8 = arith.subf %0, %7 : vector<8x32xf32>
    %9 = arith.mulf %8, %8 : vector<8x32xf32>
    %cst_6 = arith.constant dense<0.000000e+00> : vector<8xf32>
    %10 = vector.multi_reduction <add>, %9, %cst_6 [1] : vector<8x32xf32> to vector<8xf32>
    %11 = vector.shape_cast %10 : vector<8xf32> to vector<8x1xf32>
    %cst_7 = arith.constant 3.200000e+01 : f32
    %12 = vector.broadcast %cst_7 : f32 to vector<8x1xf32>
    %13 = arith.divf %11, %12 : vector<8x1xf32>
    %cst_8 = arith.constant 9.99999997E-7 : f32
    %14 = vector.broadcast %cst_8 : f32 to vector<8x1xf32>
    %15 = arith.addf %13, %14 : vector<8x1xf32>
    %16 = math.rsqrt %15 : vector<8x1xf32>
    %17 = vector.broadcast %16 : vector<8x1xf32> to vector<8x32xf32>
    %18 = arith.mulf %8, %17 : vector<8x32xf32>
    %19 = vector.broadcast %1 : vector<1x32xf32> to vector<8x32xf32>
    %20 = arith.mulf %18, %19 : vector<8x32xf32>
    %21 = vector.broadcast %2 : vector<1x32xf32> to vector<8x32xf32>
    %22 = arith.addf %20, %21 : vector<8x32xf32>
    %23 = arith.truncf %22 : vector<8x32xf32> to vector<8x32xbf16>
    %c0_9 = arith.constant 0 : index
    %c0_10 = arith.constant 0 : index
    %24 = vector.load %arg4[%c0_9, %c0_10] : memref<32x1536xbf16, #tpu.memory_space<vmem>>, vector<32x1536xbf16>
    %cst_11 = arith.constant dense<0.000000e+00> : vector<8x1536xf32>
    %25 = tpu.matmul %23, %24, %cst_11 {dimension_numbers = #tpu.dot_dimension_numbers<[1], [0], [0], [1], [0, 0, 1, 1], [], []>} : vector<8x32xbf16>, vector<32x1536xbf16>, vector<8x1536xf32> -> vector<8x1536xf32>
    %c0_12 = arith.constant 0 : index
    %c0_13 = arith.constant 0 : index
    %26 = vector.load %arg5[%c0_12, %c0_13] : memref<1x1536xf32, #tpu.memory_space<vmem>>, vector<1x1536xf32>
    %27 = vector.broadcast %26 : vector<1x1536xf32> to vector<8x1536xf32>
    %28 = arith.addf %25, %27 : vector<8x1536xf32>
    %29 = vector.extract_strided_slice %28 {offsets = [0, 0], sizes = [8, 64], strides = [1, 1]} : vector<8x1536xf32> to vector<8x64xf32>
    %30 = vector.shape_cast %29 : vector<8x64xf32> to vector<1x8x64xf32>
    %31 = vector.extract_strided_slice %28 {offsets = [0, 512], sizes = [8, 64], strides = [1, 1]} : vector<8x1536xf32> to vector<8x64xf32>
    %32 = vector.shape_cast %31 : vector<8x64xf32> to vector<1x8x64xf32>
    %33 = vector.extract_strided_slice %28 {offsets = [0, 1024], sizes = [8, 64], strides = [1, 1]} : vector<8x1536xf32> to vector<8x64xf32>
    %34 = vector.shape_cast %33 : vector<8x64xf32> to vector<1x8x64xf32>
    "tpu.trace_start"() <{level = 10 : i32, message = "bqd,bkd->bqk"}> : () -> ()
    %cst_14 = arith.constant dense<0.000000e+00> : vector<1x8x8xf32>
    %35 = tpu.matmul %30, %32, %cst_14 {dimension_numbers = #tpu.dot_dimension_numbers<[2], [2], [1], [1], [0, 0, 0, 1, 1, 1], [0], [0]>} : vector<1x8x64xf32>, vector<1x8x64xf32>, vector<1x8x8xf32> -> vector<1x8x8xf32>
    "tpu.trace_stop"() : () -> ()
    %cst_15 = arith.constant dense<0xFF800000> : vector<1x8xf32>
    %36 = vector.multi_reduction <maximumf>, %35, %cst_15 [2] : vector<1x8x8xf32> to vector<1x8xf32>
    %37 = vector.shape_cast %36 : vector<1x8xf32> to vector<1x8x1xf32>
    %38 = vector.broadcast %37 : vector<1x8x1xf32> to vector<1x8x8xf32>
    %39 = arith.subf %35, %38 : vector<1x8x8xf32>
    %40 = math.exp %39 : vector<1x8x8xf32>
    %cst_16 = arith.constant dense<0.000000e+00> : vector<1x8xf32>
    %41 = vector.multi_reduction <add>, %40, %cst_16 [2] : vector<1x8x8xf32> to vector<1x8xf32>
    %42 = vector.shape_cast %41 : vector<1x8xf32> to vector<1x8x1xf32>
    %43 = tpu.reciprocal %42 {approx = true} : vector<1x8x1xf32> -> vector<1x8x1xf32>
    %44 = vector.broadcast %43 : vector<1x8x1xf32> to vector<1x8x8xf32>
    %45 = arith.mulf %40, %44 : vector<1x8x8xf32>
    "tpu.trace_start"() <{level = 10 : i32, message = "bqk,bkd->bqd"}> : () -> ()
    %cst_17 = arith.constant dense<0.000000e+00> : vector<1x8x64xf32>
    %46 = tpu.matmul %45, %34, %cst_17 {dimension_numbers = #tpu.dot_dimension_numbers<[2], [1], [1], [2], [0, 0, 0, 1, 1, 2], [0], [0]>} : vector<1x8x8xf32>, vector<1x8x64xf32>, vector<1x8x64xf32> -> vector<1x8x64xf32>
    "tpu.trace_stop"() : () -> ()
    %47 = vector.shape_cast %46 : vector<1x8x64xf32> to vector<8x64xf32>
    %c0_18 = arith.constant 0 : index
    %c0_19 = arith.constant 0 : index
    %48 = vector.load %arg15[%c0_18, %c0_19] : memref<8x512xf32, #tpu.memory_space<vmem>>, vector<8x64xf32>
    tpu.vector_store %arg15[%c0_18, %c0_19], %47 {strides = array<i32>} : memref<8x512xf32, #tpu.memory_space<vmem>>, vector<8x64xf32>,
    %49 = vector.extract_strided_slice %28 {offsets = [0, 64], sizes = [8, 64], strides = [1, 1]} : vector<8x1536xf32> to vector<8x64xf32>
    %50 = vector.shape_cast %49 : vector<8x64xf32> to vector<1x8x64xf32>
    %51 = vector.extract_strided_slice %28 {offsets = [0, 576], sizes = [8, 64], strides = [1, 1]} : vector<8x1536xf32> to vector<8x64xf32>
    %52 = vector.shape_cast %51 : vector<8x64xf32> to vector<1x8x64xf32>
    %53 = vector.extract_strided_slice %28 {offsets = [0, 1088], sizes = [8, 64], strides = [1, 1]} : vector<8x1536xf32> to vector<8x64xf32>
    %54 = vector.shape_cast %53 : vector<8x64xf32> to vector<1x8x64xf32>
    "tpu.trace_start"() <{level = 10 : i32, message = "bqd,bkd->bqk"}> : () -> ()
    %cst_20 = arith.constant dense<0.000000e+00> : vector<1x8x8xf32>
    %55 = tpu.matmul %50, %52, %cst_20 {dimension_numbers = #tpu.dot_dimension_numbers<[2], [2], [1], [1], [0, 0, 0, 1, 1, 1], [0], [0]>} : vector<1x8x64xf32>, vector<1x8x64xf32>, vector<1x8x8xf32> -> vector<1x8x8xf32>
    "tpu.trace_stop"() : () -> ()
    %cst_21 = arith.constant dense<0xFF800000> : vector<1x8xf32>
    %56 = vector.multi_reduction <maximumf>, %55, %cst_21 [2] : vector<1x8x8xf32> to vector<1x8xf32>
    %57 = vector.shape_cast %56 : vector<1x8xf32> to vector<1x8x1xf32>
    %58 = vector.broadcast %57 : vector<1x8x1xf32> to vector<1x8x8xf32>
    %59 = arith.subf %55, %58 : vector<1x8x8xf32>
    %60 = math.exp %59 : vector<1x8x8xf32>
    %cst_22 = arith.constant dense<0.000000e+00> : vector<1x8xf32>
    %61 = vector.multi_reduction <add>, %60, %cst_22 [2] : vector<1x8x8xf32> to vector<1x8xf32>
    %62 = vector.shape_cast %61 : vector<1x8xf32> to vector<1x8x1xf32>
    %63 = tpu.reciprocal %62 {approx = true} : vector<1x8x1xf32> -> vector<1x8x1xf32>
    %64 = vector.broadcast %63 : vector<1x8x1xf32> to vector<1x8x8xf32>
    %65 = arith.mulf %60, %64 : vector<1x8x8xf32>
    "tpu.trace_start"() <{level = 10 : i32, message = "bqk,bkd->bqd"}> : () -> ()
    %cst_23 = arith.constant dense<0.000000e+00> : vector<1x8x64xf32>
    %66 = tpu.matmul %65, %54, %cst_23 {dimension_numbers = #tpu.dot_dimension_numbers<[2], [1], [1], [2], [0, 0, 0, 1, 1, 2], [0], [0]>} : vector<1x8x8xf32>, vector<1x8x64xf32>, vector<1x8x64xf32> -> vector<1x8x64xf32>
    "tpu.trace_stop"() : () -> ()
    %67 = vector.shape_cast %66 : vector<1x8x64xf32> to vector<8x64xf32>
    %c0_24 = arith.constant 0 : index
    %c64 = arith.constant 64 : index
    %68 = vector.load %arg15[%c0_24, %c64] : memref<8x512xf32, #tpu.memory_space<vmem>>, vector<8x64xf32>
    tpu.vector_store %arg15[%c0_24, %c64], %67 {strides = array<i32>} : memref<8x512xf32, #tpu.memory_space<vmem>>, vector<8x64xf32>,
    %69 = vector.extract_strided_slice %28 {offsets = [0, 128], sizes = [8, 64], strides = [1, 1]} : vector<8x1536xf32> to vector<8x64xf32>
    %70 = vector.shape_cast %69 : vector<8x64xf32> to vector<1x8x64xf32>
    %71 = vector.extract_strided_slice %28 {offsets = [0, 640], sizes = [8, 64], strides = [1, 1]} : vector<8x1536xf32> to vector<8x64xf32>
    %72 = vector.shape_cast %71 : vector<8x64xf32> to vector<1x8x64xf32>
    %73 = vector.extract_strided_slice %28 {offsets = [0, 1152], sizes = [8, 64], strides = [1, 1]} : vector<8x1536xf32> to vector<8x64xf32>
    %74 = vector.shape_cast %73 : vector<8x64xf32> to vector<1x8x64xf32>
    "tpu.trace_start"() <{level = 10 : i32, message = "bqd,bkd->bqk"}> : () -> ()
    %cst_25 = arith.constant dense<0.000000e+00> : vector<1x8x8xf32>
    %75 = tpu.matmul %70, %72, %cst_25 {dimension_numbers = #tpu.dot_dimension_numbers<[2], [2], [1], [1], [0, 0, 0, 1, 1, 1], [0], [0]>} : vector<1x8x64xf32>, vector<1x8x64xf32>, vector<1x8x8xf32> -> vector<1x8x8xf32>
    "tpu.trace_stop"() : () -> ()
    %cst_26 = arith.constant dense<0xFF800000> : vector<1x8xf32>
    %76 = vector.multi_reduction <maximumf>, %75, %cst_26 [2] : vector<1x8x8xf32> to vector<1x8xf32>
    %77 = vector.shape_cast %76 : vector<1x8xf32> to vector<1x8x1xf32>
    %78 = vector.broadcast %77 : vector<1x8x1xf32> to vector<1x8x8xf32>
    %79 = arith.subf %75, %78 : vector<1x8x8xf32>
    %80 = math.exp %79 : vector<1x8x8xf32>
    %cst_27 = arith.constant dense<0.000000e+00> : vector<1x8xf32>
    %81 = vector.multi_reduction <add>, %80, %cst_27 [2] : vector<1x8x8xf32> to vector<1x8xf32>
    %82 = vector.shape_cast %81 : vector<1x8xf32> to vector<1x8x1xf32>
    %83 = tpu.reciprocal %82 {approx = true} : vector<1x8x1xf32> -> vector<1x8x1xf32>
    %84 = vector.broadcast %83 : vector<1x8x1xf32> to vector<1x8x8xf32>
    %85 = arith.mulf %80, %84 : vector<1x8x8xf32>
    "tpu.trace_start"() <{level = 10 : i32, message = "bqk,bkd->bqd"}> : () -> ()
    %cst_28 = arith.constant dense<0.000000e+00> : vector<1x8x64xf32>
    %86 = tpu.matmul %85, %74, %cst_28 {dimension_numbers = #tpu.dot_dimension_numbers<[2], [1], [1], [2], [0, 0, 0, 1, 1, 2], [0], [0]>} : vector<1x8x8xf32>, vector<1x8x64xf32>, vector<1x8x64xf32> -> vector<1x8x64xf32>
    "tpu.trace_stop"() : () -> ()
    %87 = vector.shape_cast %86 : vector<1x8x64xf32> to vector<8x64xf32>
    %c0_29 = arith.constant 0 : index
    %c128 = arith.constant 128 : index
    %88 = vector.load %arg15[%c0_29, %c128] : memref<8x512xf32, #tpu.memory_space<vmem>>, vector<8x64xf32>
    tpu.vector_store %arg15[%c0_29, %c128], %87 {strides = array<i32>} : memref<8x512xf32, #tpu.memory_space<vmem>>, vector<8x64xf32>,
    %89 = vector.extract_strided_slice %28 {offsets = [0, 192], sizes = [8, 64], strides = [1, 1]} : vector<8x1536xf32> to vector<8x64xf32>
    %90 = vector.shape_cast %89 : vector<8x64xf32> to vector<1x8x64xf32>
    %91 = vector.extract_strided_slice %28 {offsets = [0, 704], sizes = [8, 64], strides = [1, 1]} : vector<8x1536xf32> to vector<8x64xf32>
    %92 = vector.shape_cast %91 : vector<8x64xf32> to vector<1x8x64xf32>
    %93 = vector.extract_strided_slice %28 {offsets = [0, 1216], sizes = [8, 64], strides = [1, 1]} : vector<8x1536xf32> to vector<8x64xf32>
    %94 = vector.shape_cast %93 : vector<8x64xf32> to vector<1x8x64xf32>
    "tpu.trace_start"() <{level = 10 : i32, message = "bqd,bkd->bqk"}> : () -> ()
    %cst_30 = arith.constant dense<0.000000e+00> : vector<1x8x8xf32>
    %95 = tpu.matmul %90, %92, %cst_30 {dimension_numbers = #tpu.dot_dimension_numbers<[2], [2], [1], [1], [0, 0, 0, 1, 1, 1], [0], [0]>} : vector<1x8x64xf32>, vector<1x8x64xf32>, vector<1x8x8xf32> -> vector<1x8x8xf32>
    "tpu.trace_stop"() : () -> ()
    %cst_31 = arith.constant dense<0xFF800000> : vector<1x8xf32>
    %96 = vector.multi_reduction <maximumf>, %95, %cst_31 [2] : vector<1x8x8xf32> to vector<1x8xf32>
    %97 = vector.shape_cast %96 : vector<1x8xf32> to vector<1x8x1xf32>
    %98 = vector.broadcast %97 : vector<1x8x1xf32> to vector<1x8x8xf32>
    %99 = arith.subf %95, %98 : vector<1x8x8xf32>
    %100 = math.exp %99 : vector<1x8x8xf32>
    %cst_32 = arith.constant dense<0.000000e+00> : vector<1x8xf32>
    %101 = vector.multi_reduction <add>, %100, %cst_32 [2] : vector<1x8x8xf32> to vector<1x8xf32>
    %102 = vector.shape_cast %101 : vector<1x8xf32> to vector<1x8x1xf32>
    %103 = tpu.reciprocal %102 {approx = true} : vector<1x8x1xf32> -> vector<1x8x1xf32>
    %104 = vector.broadcast %103 : vector<1x8x1xf32> to vector<1x8x8xf32>
    %105 = arith.mulf %100, %104 : vector<1x8x8xf32>
    "tpu.trace_start"() <{level = 10 : i32, message = "bqk,bkd->bqd"}> : () -> ()
    %cst_33 = arith.constant dense<0.000000e+00> : vector<1x8x64xf32>
    %106 = tpu.matmul %105, %94, %cst_33 {dimension_numbers = #tpu.dot_dimension_numbers<[2], [1], [1], [2], [0, 0, 0, 1, 1, 2], [0], [0]>} : vector<1x8x8xf32>, vector<1x8x64xf32>, vector<1x8x64xf32> -> vector<1x8x64xf32>
    "tpu.trace_stop"() : () -> ()
    %107 = vector.shape_cast %106 : vector<1x8x64xf32> to vector<8x64xf32>
    %c0_34 = arith.constant 0 : index
    %c192 = arith.constant 192 : index
    %108 = vector.load %arg15[%c0_34, %c192] : memref<8x512xf32, #tpu.memory_space<vmem>>, vector<8x64xf32>
    tpu.vector_store %arg15[%c0_34, %c192], %107 {strides = array<i32>} : memref<8x512xf32, #tpu.memory_space<vmem>>, vector<8x64xf32>,
    %109 = vector.extract_strided_slice %28 {offsets = [0, 256], sizes = [8, 64], strides = [1, 1]} : vector<8x1536xf32> to vector<8x64xf32>
    %110 = vector.shape_cast %109 : vector<8x64xf32> to vector<1x8x64xf32>
    %111 = vector.extract_strided_slice %28 {offsets = [0, 768], sizes = [8, 64], strides = [1, 1]} : vector<8x1536xf32> to vector<8x64xf32>
    %112 = vector.shape_cast %111 : vector<8x64xf32> to vector<1x8x64xf32>
    %113 = vector.extract_strided_slice %28 {offsets = [0, 1280], sizes = [8, 64], strides = [1, 1]} : vector<8x1536xf32> to vector<8x64xf32>
    %114 = vector.shape_cast %113 : vector<8x64xf32> to vector<1x8x64xf32>
    "tpu.trace_start"() <{level = 10 : i32, message = "bqd,bkd->bqk"}> : () -> ()
    %cst_35 = arith.constant dense<0.000000e+00> : vector<1x8x8xf32>
    %115 = tpu.matmul %110, %112, %cst_35 {dimension_numbers = #tpu.dot_dimension_numbers<[2], [2], [1], [1], [0, 0, 0, 1, 1, 1], [0], [0]>} : vector<1x8x64xf32>, vector<1x8x64xf32>, vector<1x8x8xf32> -> vector<1x8x8xf32>
    "tpu.trace_stop"() : () -> ()
    %cst_36 = arith.constant dense<0xFF800000> : vector<1x8xf32>
    %116 = vector.multi_reduction <maximumf>, %115, %cst_36 [2] : vector<1x8x8xf32> to vector<1x8xf32>
    %117 = vector.shape_cast %116 : vector<1x8xf32> to vector<1x8x1xf32>
    %118 = vector.broadcast %117 : vector<1x8x1xf32> to vector<1x8x8xf32>
    %119 = arith.subf %115, %118 : vector<1x8x8xf32>
    %120 = math.exp %119 : vector<1x8x8xf32>
    %cst_37 = arith.constant dense<0.000000e+00> : vector<1x8xf32>
    %121 = vector.multi_reduction <add>, %120, %cst_37 [2] : vector<1x8x8xf32> to vector<1x8xf32>
    %122 = vector.shape_cast %121 : vector<1x8xf32> to vector<1x8x1xf32>
    %123 = tpu.reciprocal %122 {approx = true} : vector<1x8x1xf32> -> vector<1x8x1xf32>
    %124 = vector.broadcast %123 : vector<1x8x1xf32> to vector<1x8x8xf32>
    %125 = arith.mulf %120, %124 : vector<1x8x8xf32>
    "tpu.trace_start"() <{level = 10 : i32, message = "bqk,bkd->bqd"}> : () -> ()
    %cst_38 = arith.constant dense<0.000000e+00> : vector<1x8x64xf32>
    %126 = tpu.matmul %125, %114, %cst_38 {dimension_numbers = #tpu.dot_dimension_numbers<[2], [1], [1], [2], [0, 0, 0, 1, 1, 2], [0], [0]>} : vector<1x8x8xf32>, vector<1x8x64xf32>, vector<1x8x64xf32> -> vector<1x8x64xf32>
    "tpu.trace_stop"() : () -> ()
    %127 = vector.shape_cast %126 : vector<1x8x64xf32> to vector<8x64xf32>
    %c0_39 = arith.constant 0 : index
    %c256 = arith.constant 256 : index
    %128 = vector.load %arg15[%c0_39, %c256] : memref<8x512xf32, #tpu.memory_space<vmem>>, vector<8x64xf32>
    tpu.vector_store %arg15[%c0_39, %c256], %127 {strides = array<i32>} : memref<8x512xf32, #tpu.memory_space<vmem>>, vector<8x64xf32>,
    %129 = vector.extract_strided_slice %28 {offsets = [0, 320], sizes = [8, 64], strides = [1, 1]} : vector<8x1536xf32> to vector<8x64xf32>
    %130 = vector.shape_cast %129 : vector<8x64xf32> to vector<1x8x64xf32>
    %131 = vector.extract_strided_slice %28 {offsets = [0, 832], sizes = [8, 64], strides = [1, 1]} : vector<8x1536xf32> to vector<8x64xf32>
    %132 = vector.shape_cast %131 : vector<8x64xf32> to vector<1x8x64xf32>
    %133 = vector.extract_strided_slice %28 {offsets = [0, 1344], sizes = [8, 64], strides = [1, 1]} : vector<8x1536xf32> to vector<8x64xf32>
    %134 = vector.shape_cast %133 : vector<8x64xf32> to vector<1x8x64xf32>
    "tpu.trace_start"() <{level = 10 : i32, message = "bqd,bkd->bqk"}> : () -> ()
    %cst_40 = arith.constant dense<0.000000e+00> : vector<1x8x8xf32>
    %135 = tpu.matmul %130, %132, %cst_40 {dimension_numbers = #tpu.dot_dimension_numbers<[2], [2], [1], [1], [0, 0, 0, 1, 1, 1], [0], [0]>} : vector<1x8x64xf32>, vector<1x8x64xf32>, vector<1x8x8xf32> -> vector<1x8x8xf32>
    "tpu.trace_stop"() : () -> ()
    %cst_41 = arith.constant dense<0xFF800000> : vector<1x8xf32>
    %136 = vector.multi_reduction <maximumf>, %135, %cst_41 [2] : vector<1x8x8xf32> to vector<1x8xf32>
    %137 = vector.shape_cast %136 : vector<1x8xf32> to vector<1x8x1xf32>
    %138 = vector.broadcast %137 : vector<1x8x1xf32> to vector<1x8x8xf32>
    %139 = arith.subf %135, %138 : vector<1x8x8xf32>
    %140 = math.exp %139 : vector<1x8x8xf32>
    %cst_42 = arith.constant dense<0.000000e+00> : vector<1x8xf32>
    %141 = vector.multi_reduction <add>, %140, %cst_42 [2] : vector<1x8x8xf32> to vector<1x8xf32>
    %142 = vector.shape_cast %141 : vector<1x8xf32> to vector<1x8x1xf32>
    %143 = tpu.reciprocal %142 {approx = true} : vector<1x8x1xf32> -> vector<1x8x1xf32>
    %144 = vector.broadcast %143 : vector<1x8x1xf32> to vector<1x8x8xf32>
    %145 = arith.mulf %140, %144 : vector<1x8x8xf32>
    "tpu.trace_start"() <{level = 10 : i32, message = "bqk,bkd->bqd"}> : () -> ()
    %cst_43 = arith.constant dense<0.000000e+00> : vector<1x8x64xf32>
    %146 = tpu.matmul %145, %134, %cst_43 {dimension_numbers = #tpu.dot_dimension_numbers<[2], [1], [1], [2], [0, 0, 0, 1, 1, 2], [0], [0]>} : vector<1x8x8xf32>, vector<1x8x64xf32>, vector<1x8x64xf32> -> vector<1x8x64xf32>
    "tpu.trace_stop"() : () -> ()
    %147 = vector.shape_cast %146 : vector<1x8x64xf32> to vector<8x64xf32>
    %c0_44 = arith.constant 0 : index
    %c320 = arith.constant 320 : index
    %148 = vector.load %arg15[%c0_44, %c320] : memref<8x512xf32, #tpu.memory_space<vmem>>, vector<8x64xf32>
    tpu.vector_store %arg15[%c0_44, %c320], %147 {strides = array<i32>} : memref<8x512xf32, #tpu.memory_space<vmem>>, vector<8x64xf32>,
    %149 = vector.extract_strided_slice %28 {offsets = [0, 384], sizes = [8, 64], strides = [1, 1]} : vector<8x1536xf32> to vector<8x64xf32>
    %150 = vector.shape_cast %149 : vector<8x64xf32> to vector<1x8x64xf32>
    %151 = vector.extract_strided_slice %28 {offsets = [0, 896], sizes = [8, 64], strides = [1, 1]} : vector<8x1536xf32> to vector<8x64xf32>
    %152 = vector.shape_cast %151 : vector<8x64xf32> to vector<1x8x64xf32>
    %153 = vector.extract_strided_slice %28 {offsets = [0, 1408], sizes = [8, 64], strides = [1, 1]} : vector<8x1536xf32> to vector<8x64xf32>
    %154 = vector.shape_cast %153 : vector<8x64xf32> to vector<1x8x64xf32>
    "tpu.trace_start"() <{level = 10 : i32, message = "bqd,bkd->bqk"}> : () -> ()
    %cst_45 = arith.constant dense<0.000000e+00> : vector<1x8x8xf32>
    %155 = tpu.matmul %150, %152, %cst_45 {dimension_numbers = #tpu.dot_dimension_numbers<[2], [2], [1], [1], [0, 0, 0, 1, 1, 1], [0], [0]>} : vector<1x8x64xf32>, vector<1x8x64xf32>, vector<1x8x8xf32> -> vector<1x8x8xf32>
    "tpu.trace_stop"() : () -> ()
    %cst_46 = arith.constant dense<0xFF800000> : vector<1x8xf32>
    %156 = vector.multi_reduction <maximumf>, %155, %cst_46 [2] : vector<1x8x8xf32> to vector<1x8xf32>
    %157 = vector.shape_cast %156 : vector<1x8xf32> to vector<1x8x1xf32>
    %158 = vector.broadcast %157 : vector<1x8x1xf32> to vector<1x8x8xf32>
    %159 = arith.subf %155, %158 : vector<1x8x8xf32>
    %160 = math.exp %159 : vector<1x8x8xf32>
    %cst_47 = arith.constant dense<0.000000e+00> : vector<1x8xf32>
    %161 = vector.multi_reduction <add>, %160, %cst_47 [2] : vector<1x8x8xf32> to vector<1x8xf32>
    %162 = vector.shape_cast %161 : vector<1x8xf32> to vector<1x8x1xf32>
    %163 = tpu.reciprocal %162 {approx = true} : vector<1x8x1xf32> -> vector<1x8x1xf32>
    %164 = vector.broadcast %163 : vector<1x8x1xf32> to vector<1x8x8xf32>
    %165 = arith.mulf %160, %164 : vector<1x8x8xf32>
    "tpu.trace_start"() <{level = 10 : i32, message = "bqk,bkd->bqd"}> : () -> ()
    %cst_48 = arith.constant dense<0.000000e+00> : vector<1x8x64xf32>
    %166 = tpu.matmul %165, %154, %cst_48 {dimension_numbers = #tpu.dot_dimension_numbers<[2], [1], [1], [2], [0, 0, 0, 1, 1, 2], [0], [0]>} : vector<1x8x8xf32>, vector<1x8x64xf32>, vector<1x8x64xf32> -> vector<1x8x64xf32>
    "tpu.trace_stop"() : () -> ()
    %167 = vector.shape_cast %166 : vector<1x8x64xf32> to vector<8x64xf32>
    %c0_49 = arith.constant 0 : index
    %c384 = arith.constant 384 : index
    %168 = vector.load %arg15[%c0_49, %c384] : memref<8x512xf32, #tpu.memory_space<vmem>>, vector<8x64xf32>
    tpu.vector_store %arg15[%c0_49, %c384], %167 {strides = array<i32>} : memref<8x512xf32, #tpu.memory_space<vmem>>, vector<8x64xf32>,
    %169 = vector.extract_strided_slice %28 {offsets = [0, 448], sizes = [8, 64], strides = [1, 1]} : vector<8x1536xf32> to vector<8x64xf32>
    %170 = vector.shape_cast %169 : vector<8x64xf32> to vector<1x8x64xf32>
    %171 = vector.extract_strided_slice %28 {offsets = [0, 960], sizes = [8, 64], strides = [1, 1]} : vector<8x1536xf32> to vector<8x64xf32>
    %172 = vector.shape_cast %171 : vector<8x64xf32> to vector<1x8x64xf32>
    %173 = vector.extract_strided_slice %28 {offsets = [0, 1472], sizes = [8, 64], strides = [1, 1]} : vector<8x1536xf32> to vector<8x64xf32>
    %174 = vector.shape_cast %173 : vector<8x64xf32> to vector<1x8x64xf32>
    "tpu.trace_start"() <{level = 10 : i32, message = "bqd,bkd->bqk"}> : () -> ()
    %cst_50 = arith.constant dense<0.000000e+00> : vector<1x8x8xf32>
    %175 = tpu.matmul %170, %172, %cst_50 {dimension_numbers = #tpu.dot_dimension_numbers<[2], [2], [1], [1], [0, 0, 0, 1, 1, 1], [0], [0]>} : vector<1x8x64xf32>, vector<1x8x64xf32>, vector<1x8x8xf32> -> vector<1x8x8xf32>
    "tpu.trace_stop"() : () -> ()
    %cst_51 = arith.constant dense<0xFF800000> : vector<1x8xf32>
    %176 = vector.multi_reduction <maximumf>, %175, %cst_51 [2] : vector<1x8x8xf32> to vector<1x8xf32>
    %177 = vector.shape_cast %176 : vector<1x8xf32> to vector<1x8x1xf32>
    %178 = vector.broadcast %177 : vector<1x8x1xf32> to vector<1x8x8xf32>
    %179 = arith.subf %175, %178 : vector<1x8x8xf32>
    %180 = math.exp %179 : vector<1x8x8xf32>
    %cst_52 = arith.constant dense<0.000000e+00> : vector<1x8xf32>
    %181 = vector.multi_reduction <add>, %180, %cst_52 [2] : vector<1x8x8xf32> to vector<1x8xf32>
    %182 = vector.shape_cast %181 : vector<1x8xf32> to vector<1x8x1xf32>
    %183 = tpu.reciprocal %182 {approx = true} : vector<1x8x1xf32> -> vector<1x8x1xf32>
    %184 = vector.broadcast %183 : vector<1x8x1xf32> to vector<1x8x8xf32>
    %185 = arith.mulf %180, %184 : vector<1x8x8xf32>
    "tpu.trace_start"() <{level = 10 : i32, message = "bqk,bkd->bqd"}> : () -> ()
    %cst_53 = arith.constant dense<0.000000e+00> : vector<1x8x64xf32>
    %186 = tpu.matmul %185, %174, %cst_53 {dimension_numbers = #tpu.dot_dimension_numbers<[2], [1], [1], [2], [0, 0, 0, 1, 1, 2], [0], [0]>} : vector<1x8x8xf32>, vector<1x8x64xf32>, vector<1x8x64xf32> -> vector<1x8x64xf32>
    "tpu.trace_stop"() : () -> ()
    %187 = vector.shape_cast %186 : vector<1x8x64xf32> to vector<8x64xf32>
    %c0_54 = arith.constant 0 : index
    %c448 = arith.constant 448 : index
    %188 = vector.load %arg15[%c0_54, %c448] : memref<8x512xf32, #tpu.memory_space<vmem>>, vector<8x64xf32>
    tpu.vector_store %arg15[%c0_54, %c448], %187 {strides = array<i32>} : memref<8x512xf32, #tpu.memory_space<vmem>>, vector<8x64xf32>,
    %c0_55 = arith.constant 0 : index
    %c0_56 = arith.constant 0 : index
    %189 = vector.load %arg15[%c0_55, %c0_56] : memref<8x512xf32, #tpu.memory_space<vmem>>, vector<8x512xf32>
    %190 = arith.truncf %189 : vector<8x512xf32> to vector<8x512xbf16>
    %c0_57 = arith.constant 0 : index
    %c0_58 = arith.constant 0 : index
    %191 = vector.load %arg6[%c0_57, %c0_58] : memref<512x32xbf16, #tpu.memory_space<vmem>>, vector<512x32xbf16>
    %cst_59 = arith.constant dense<0.000000e+00> : vector<8x32xf32>
    %192 = tpu.matmul %190, %191, %cst_59 {dimension_numbers = #tpu.dot_dimension_numbers<[1], [0], [0], [1], [0, 0, 1, 1], [], []>} : vector<8x512xbf16>, vector<512x32xbf16>, vector<8x32xf32> -> vector<8x32xf32>
    %c0_60 = arith.constant 0 : index
    %c0_61 = arith.constant 0 : index
    %193 = vector.load %arg7[%c0_60, %c0_61] : memref<1x32xf32, #tpu.memory_space<vmem>>, vector<1x32xf32>
    %194 = vector.broadcast %193 : vector<1x32xf32> to vector<8x32xf32>
    %195 = arith.addf %192, %194 : vector<8x32xf32>
    %196 = arith.addf %0, %195 : vector<8x32xf32>
    %c0_62 = arith.constant 0 : index
    %c0_63 = arith.constant 0 : index
    %197 = vector.load %arg8[%c0_62, %c0_63] : memref<1x32xf32, #tpu.memory_space<vmem>>, vector<1x32xf32>
    %c0_64 = arith.constant 0 : index
    %c0_65 = arith.constant 0 : index
    %198 = vector.load %arg9[%c0_64, %c0_65] : memref<1x32xf32, #tpu.memory_space<vmem>>, vector<1x32xf32>
    %cst_66 = arith.constant dense<0.000000e+00> : vector<8xf32>
    %199 = vector.multi_reduction <add>, %196, %cst_66 [1] : vector<8x32xf32> to vector<8xf32>
    %200 = vector.shape_cast %199 : vector<8xf32> to vector<8x1xf32>
    %cst_67 = arith.constant 3.200000e+01 : f32
    %201 = vector.broadcast %cst_67 : f32 to vector<8x1xf32>
    %202 = arith.divf %200, %201 : vector<8x1xf32>
    %203 = vector.broadcast %202 : vector<8x1xf32> to vector<8x32xf32>
    %204 = arith.subf %196, %203 : vector<8x32xf32>
    %205 = arith.mulf %204, %204 : vector<8x32xf32>
    %cst_68 = arith.constant dense<0.000000e+00> : vector<8xf32>
    %206 = vector.multi_reduction <add>, %205, %cst_68 [1] : vector<8x32xf32> to vector<8xf32>
    %207 = vector.shape_cast %206 : vector<8xf32> to vector<8x1xf32>
    %cst_69 = arith.constant 3.200000e+01 : f32
    %208 = vector.broadcast %cst_69 : f32 to vector<8x1xf32>
    %209 = arith.divf %207, %208 : vector<8x1xf32>
    %cst_70 = arith.constant 9.99999997E-7 : f32
    %210 = vector.broadcast %cst_70 : f32 to vector<8x1xf32>
    %211 = arith.addf %209, %210 : vector<8x1xf32>
    %212 = math.rsqrt %211 : vector<8x1xf32>
    %213 = vector.broadcast %212 : vector<8x1xf32> to vector<8x32xf32>
    %214 = arith.mulf %204, %213 : vector<8x32xf32>
    %215 = vector.broadcast %197 : vector<1x32xf32> to vector<8x32xf32>
    %216 = arith.mulf %214, %215 : vector<8x32xf32>
    %217 = vector.broadcast %198 : vector<1x32xf32> to vector<8x32xf32>
    %218 = arith.addf %216, %217 : vector<8x32xf32>
    %219 = arith.truncf %218 : vector<8x32xf32> to vector<8x32xbf16>
    %c0_71 = arith.constant 0 : index
    %c0_72 = arith.constant 0 : index
    %220 = vector.load %arg10[%c0_71, %c0_72] : memref<32x128xbf16, #tpu.memory_space<vmem>>, vector<32x128xbf16>
    %cst_73 = arith.constant dense<0.000000e+00> : vector<8x128xf32>
    %221 = tpu.matmul %219, %220, %cst_73 {dimension_numbers = #tpu.dot_dimension_numbers<[1], [0], [0], [1], [0, 0, 1, 1], [], []>} : vector<8x32xbf16>, vector<32x128xbf16>, vector<8x128xf32> -> vector<8x128xf32>
    %c0_74 = arith.constant 0 : index
    %c0_75 = arith.constant 0 : index
    %222 = vector.load %arg11[%c0_74, %c0_75] : memref<1x128xf32, #tpu.memory_space<vmem>>, vector<1x128xf32>
    %223 = vector.broadcast %222 : vector<1x128xf32> to vector<8x128xf32>
    %224 = arith.addf %221, %223 : vector<8x128xf32>
    %cst_76 = arith.constant 5.000000e-01 : f32
    %225 = vector.broadcast %cst_76 : f32 to vector<8x128xf32>
    %226 = arith.mulf %225, %224 : vector<8x128xf32>
    %cst_77 = arith.constant 0.707106769 : f32
    %227 = vector.broadcast %cst_77 : f32 to vector<8x128xf32>
    %228 = arith.mulf %224, %227 : vector<8x128xf32>
    %cst_78 = arith.constant 0.000000e+00 : f32
    %229 = vector.broadcast %cst_78 : f32 to vector<8x128xf32>
    %230 = arith.cmpf oge, %228, %229 : vector<8x128xf32>
    %cst_79 = arith.constant 1.000000e+00 : f32
    %cst_80 = arith.constant -1.000000e+00 : f32
    %231 = vector.broadcast %cst_79 : f32 to vector<8x128xf32>
    %232 = vector.broadcast %cst_80 : f32 to vector<8x128xf32>
    %233 = arith.select %230, %231, %232 : vector<8x128xi1>, vector<8x128xf32>
    %234 = math.absf %228 : vector<8x128xf32>
    %cst_81 = arith.constant 0.327591091 : f32
    %235 = vector.broadcast %cst_81 : f32 to vector<8x128xf32>
    %236 = arith.mulf %235, %234 : vector<8x128xf32>
    %cst_82 = arith.constant 1.000000e+00 : f32
    %237 = vector.broadcast %cst_82 : f32 to vector<8x128xf32>
    %238 = arith.addf %237, %236 : vector<8x128xf32>
    %cst_83 = arith.constant 1.000000e+00 : f32
    %239 = vector.broadcast %cst_83 : f32 to vector<8x128xf32>
    %240 = arith.divf %239, %238 : vector<8x128xf32>
    %cst_84 = arith.constant 1.06140542 : f32
    %241 = vector.broadcast %cst_84 : f32 to vector<8x128xf32>
    %242 = arith.mulf %240, %241 : vector<8x128xf32>
    %cst_85 = arith.constant -1.45315206 : f32
    %243 = vector.broadcast %cst_85 : f32 to vector<8x128xf32>
    %244 = arith.addf %243, %242 : vector<8x128xf32>
    %245 = arith.mulf %240, %244 : vector<8x128xf32>
    %cst_86 = arith.constant 1.42141378 : f32
    %246 = vector.broadcast %cst_86 : f32 to vector<8x128xf32>
    %247 = arith.addf %246, %245 : vector<8x128xf32>
    %248 = arith.mulf %240, %247 : vector<8x128xf32>
    %cst_87 = arith.constant -0.284496725 : f32
    %249 = vector.broadcast %cst_87 : f32 to vector<8x128xf32>
    %250 = arith.addf %249, %248 : vector<8x128xf32>
    %251 = arith.mulf %240, %250 : vector<8x128xf32>
    %cst_88 = arith.constant 0.254829586 : f32
    %252 = vector.broadcast %cst_88 : f32 to vector<8x128xf32>
    %253 = arith.addf %252, %251 : vector<8x128xf32>
    %254 = arith.mulf %240, %253 : vector<8x128xf32>
    %cst_89 = arith.constant 0.000000e+00 : f32
    %255 = vector.broadcast %cst_89 : f32 to vector<8x128xf32>
    %256 = arith.subf %255, %234 : vector<8x128xf32>
    %257 = arith.mulf %256, %234 : vector<8x128xf32>
    %258 = math.exp %257 : vector<8x128xf32>
    %259 = arith.mulf %254, %258 : vector<8x128xf32>
    %cst_90 = arith.constant 1.000000e+00 : f32
    %260 = vector.broadcast %cst_90 : f32 to vector<8x128xf32>
    %261 = arith.subf %260, %259 : vector<8x128xf32>
    %262 = arith.mulf %233, %261 : vector<8x128xf32>
    %cst_91 = arith.constant 1.000000e+00 : f32
    %263 = vector.broadcast %cst_91 : f32 to vector<8x128xf32>
    %264 = arith.addf %263, %262 : vector<8x128xf32>
    %265 = arith.mulf %226, %264 : vector<8x128xf32>
    %266 = arith.truncf %265 : vector<8x128xf32> to vector<8x128xbf16>
    %c0_92 = arith.constant 0 : index
    %c0_93 = arith.constant 0 : index
    %267 = vector.load %arg12[%c0_92, %c0_93] : memref<128x32xbf16, #tpu.memory_space<vmem>>, vector<128x32xbf16>
    %cst_94 = arith.constant dense<0.000000e+00> : vector<8x32xf32>
    %268 = tpu.matmul %266, %267, %cst_94 {dimension_numbers = #tpu.dot_dimension_numbers<[1], [0], [0], [1], [0, 0, 1, 1], [], []>} : vector<8x128xbf16>, vector<128x32xbf16>, vector<8x32xf32> -> vector<8x32xf32>
    %c0_95 = arith.constant 0 : index
    %c0_96 = arith.constant 0 : index
    %269 = vector.load %arg13[%c0_95, %c0_96] : memref<1x32xf32, #tpu.memory_space<vmem>>, vector<1x32xf32>
    %270 = vector.broadcast %269 : vector<1x32xf32> to vector<8x32xf32>
    %271 = arith.addf %268, %270 : vector<8x32xf32>
    %272 = arith.addf %196, %271 : vector<8x32xf32>
    %c0_97 = arith.constant 0 : index
    %c0_98 = arith.constant 0 : index
    %273 = vector.load %arg14[%c0_97, %c0_98] : memref<8x32xf32, #tpu.memory_space<vmem>>, vector<8x32xf32>
    tpu.vector_store %arg14[%c0_97, %c0_98], %272 {strides = array<i32>} : memref<8x32xf32, #tpu.memory_space<vmem>>, vector<8x32xf32>,
    return
  }
  func.func @transform_0(%arg0: i32) -> (i32, i32) {
    %c0_i32 = arith.constant 0 : i32
    %c0_i32_0 = arith.constant 0 : i32
    return %arg0, %c0_i32 : i32, i32
  }
  func.func @transform_1(%arg0: i32) -> (i32, i32) {
    %c0_i32 = arith.constant 0 : i32
    %c0_i32_0 = arith.constant 0 : i32
    %c0_i32_1 = arith.constant 0 : i32
    return %c0_i32, %c0_i32_0 : i32, i32
  }
  func.func @transform_2(%arg0: i32) -> (i32, i32) {
    %c0_i32 = arith.constant 0 : i32
    %c0_i32_0 = arith.constant 0 : i32
    %c0_i32_1 = arith.constant 0 : i32
    return %c0_i32, %c0_i32_0 : i32, i32
  }
  func.func @transform_3(%arg0: i32) -> (i32, i32) {
    %c0_i32 = arith.constant 0 : i32
    %c0_i32_0 = arith.constant 0 : i32
    %c0_i32_1 = arith.constant 0 : i32
    return %c0_i32, %c0_i32_0 : i32, i32
  }
  func.func @transform_4(%arg0: i32) -> (i32, i32) {
    %c0_i32 = arith.constant 0 : i32
    %c0_i32_0 = arith.constant 0 : i32
    %c0_i32_1 = arith.constant 0 : i32
    return %c0_i32, %c0_i32_0 : i32, i32
  }
  func.func @transform_5(%arg0: i32) -> (i32, i32) {
    %c0_i32 = arith.constant 0 : i32
    %c0_i32_0 = arith.constant 0 : i32
    %c0_i32_1 = arith.constant 0 : i32
    return %c0_i32, %c0_i32_0 : i32, i32
  }
  func.func @transform_6(%arg0: i32) -> (i32, i32) {
    %c0_i32 = arith.constant 0 : i32
    %c0_i32_0 = arith.constant 0 : i32
    %c0_i32_1 = arith.constant 0 : i32
    return %c0_i32, %c0_i32_0 : i32, i32
  }
  func.func @transform_7(%arg0: i32) -> (i32, i32) {
    %c0_i32 = arith.constant 0 : i32
    %c0_i32_0 = arith.constant 0 : i32
    %c0_i32_1 = arith.constant 0 : i32
    return %c0_i32, %c0_i32_0 : i32, i32
  }
  func.func @transform_8(%arg0: i32) -> (i32, i32) {
    %c0_i32 = arith.constant 0 : i32
    %c0_i32_0 = arith.constant 0 : i32
    %c0_i32_1 = arith.constant 0 : i32
    return %c0_i32, %c0_i32_0 : i32, i32
  }
  func.func @transform_9(%arg0: i32) -> (i32, i32) {
    %c0_i32 = arith.constant 0 : i32
    %c0_i32_0 = arith.constant 0 : i32
    %c0_i32_1 = arith.constant 0 : i32
    return %c0_i32, %c0_i32_0 : i32, i32
  }
  func.func @transform_10(%arg0: i32) -> (i32, i32) {
    %c0_i32 = arith.constant 0 : i32
    %c0_i32_0 = arith.constant 0 : i32
    %c0_i32_1 = arith.constant 0 : i32
    return %c0_i32, %c0_i32_0 : i32, i32
  }
  func.func @transform_11(%arg0: i32) -> (i32, i32) {
    %c0_i32 = arith.constant 0 : i32
    %c0_i32_0 = arith.constant 0 : i32
    %c0_i32_1 = arith.constant 0 : i32
    return %c0_i32, %c0_i32_0 : i32, i32
  }
  func.func @transform_12(%arg0: i32) -> (i32, i32) {
    %c0_i32 = arith.constant 0 : i32
    %c0_i32_0 = arith.constant 0 : i32
    %c0_i32_1 = arith.constant 0 : i32
    return %c0_i32, %c0_i32_0 : i32, i32
  }
  func.func @transform_13(%arg0: i32) -> (i32, i32) {
    %c0_i32 = arith.constant 0 : i32
    %c0_i32_0 = arith.constant 0 : i32
    return %arg0, %c0_i32 : i32, i32
  }
}

</mosaic_0001>

<bundles_post_ra>
// kernel: tpu_custom_call.1
= control target key start
LH: loop header
LB: loop body
LE: loop exit
PB: predicated region body
PF: predicated region fallthrough
CT: control target
= control target key end

     0   :  { %s4053_s0 = inlined_call_operand.vmem [shape: f32[16,32], index: 0, kind: input, shape index: {}]   ;;  %s4054_s1 = inlined_call_operand.vmem [shape: f32[1,32], index: 1, kind: input, shape index: {}]   ;;  %s4055_s2 = inlined_call_operand.vmem [shape: f32[1,32], index: 2, kind: input, shape index: {}]   ;;  %s4056_s3 = inlined_call_operand.vmem [shape: bf16[32,1536], index: 3, kind: input, shape index: {}]   ;;  %s4057_s4 = inlined_call_operand.vmem [shape: f32[1,1536], index: 4, kind: input, shape index: {}]   ;;  %s4058_s5 = inlined_call_operand.vmem [shape: bf16[512,32], index: 5, kind: input, shape index: {}]   ;;  %s4059_s6 = inlined_call_operand.vmem [shape: f32[1,32], index: 6, kind: input, shape index: {}]   ;;  %s4060_s7 = inlined_call_operand.vmem [shape: f32[1,32], index: 7, kind: input, shape index: {}]   ;;  %s4061_s8 = inlined_call_operand.vmem [shape: f32[1,32], index: 8, kind: input, shape index: {}]   ;;  %s4062_s9 = inlined_call_operand.vmem [shape: bf16[32,128], index: 9, kind: input, shape index: {}]   ;;  %s4063_s10 = inlined_call_operand.vmem [shape: f32[1,128], index: 10, kind: input, shape index: {}]   ;;  %s4064_s11 = inlined_call_operand.vmem [shape: bf16[128,32], index: 11, kind: input, shape index: {}]   ;;  %s4065_s12 = inlined_call_operand.vmem [shape: f32[1,32], index: 12, kind: input, shape index: {}]   ;;  %s4066_s13 = inlined_call_operand.hbm [shape: f32[16,32], index: 13, kind: output, shape index: {}]  }
   0x1   :  { %4070 = sst [smem:[#allocation8_spill]] %s4053_s0 }
   0x2   :  { %4071 = sst [smem:[#allocation9_spill]] %s4054_s1 }
   0x3   :  { %18 = vsyncpa [#allocation4], 0 }
   0x4   :  { %20 = vsyncpa [#allocation4 + $0x1], 0  ;;  %s3531_s25 = smov 0   ;;  %s3533_s26 = smov 0  }
   0x5   :  { %s3535_s27 = smov 0   ;;  %s3537_s28 = smov 0  }
   0x6 LB: > { %4072 = sst [smem:[#allocation6_spill]] %s3449_s27  ;;  %s3552_s29 = sadd.s32 4294967295, %s3453_s28   ;;  %s3453_s28 = sphi %s3537_s28, %s4083_s28   ;;  %s3449_s27 = sphi %s3535_s27, %s4080_s27   ;;  %s3445_s26 = sphi %s3533_s26, %s4082_s26   ;;  %s3441_s25 = sphi %s3531_s25, %s4081_s25  }
   0x7   : > { %s2920_s30 = sadd.s32 4294967294, %s3453_s28   ;;  %s3556_s14 = sadd.s32 1, %s3453_s28  }
   0x8   : > { %s311_s15 = sadd.s32 1, %s3449_s27  ;;  %s308_s16 = ssub.s32 %s3453_s28, %s3556_s14 }
   0x9   : > { %p321_p0 = scmp.ne.s32.totalorder %s3449_s27, %s3445_s26  ;;  %p309_p1 = scmp.eq.s32.totalorder %s308_s16, 0 }
   0xa   : > { %p322_p2 = scmp.eq.s32.totalorder %s3552_s29, 1  ;;  %p327_p3 = scmp.ne.s32.totalorder %s3445_s26, %s3441_s25 }
   0xb   : > { %p328_p4 = scmp.eq.s32.totalorder %s2920_s30, 1  ;;  %p2923_p7 = scmp.ge.s32.totalorder %s3453_s28, 1 }
   0xc   : > { %s3567_s17 = scalar_select %p309_p1, %s3449_s27, %s311_s15  }
   0xd   : > { %p3569_p5 = por %p322_p2, %p321_p0  ;;  %p3573_p6 = por %p328_p4, %p327_p3 }
   0xe   : > { %4073 = sst [smem:[#allocation7_spill]] %s3567_s17  ;;  %p389_p8 = scmp.lt.s32.totalorder %s3453_s28, 3 }
  0x10   : > { %p390_p9 = pnand %p2923_p7, %p389_p8 }
  0x11   : > { %p432_p10 = scmp.lt.s32.totalorder (!%p390_p9), %s3552_s29, 1  ;;  %s4076_s0 = sld [smem:[#allocation8_spill]] (!%p390_p9) }
  0x12   : > { %393 = sbr.rel (%p390_p9) target bundleno = 2927 (0xb6f), region = 72  ;;  %s4077_s1 = sld [smem:[#allocation9_spill]] (!%p390_p9) }
  0x13   : > { %s4078_s27 = smov (!%p390_p9), 64   ;;  %s3031_s30 = sshll.u32 (!%p390_p9), %s3552_s29, 7 }
  0x17   : > { %s433_s20 = scalar_select %p432_p10, %s3552_s29, 1  ;;  %vm440_vm0 = vcmask 261120   ;;  %v3274_v7 = vld [vmem:[%s4056_s3 + $0x64] ss:$48 sps:$4 sm:$0xff]   ;;  %v3276_v8 = vld [vmem:[%s4056_s3 + $0x7c] ss:$48 sps:$4 sm:$0xff]   ;;  %v498_v42 = vlaneseq }
  0x18   : > { %v3278_v9 = vld [vmem:[%s4056_s3 + $0x60] ss:$48 sps:$4 sm:$0xff]   ;;  %v3279_v10 = vld [vmem:[%s4056_s3 + $0x78] ss:$48 sps:$4 sm:$0xff]   ;;  %693 = vmatprep.subr.bf16.mxu0 %v3274_v7  ;;  %816 = vmatprep.subr.bf16.mxu1 %v3276_v8  ;;  %v3280_v11 = vld [vmem:[%s4056_s3 + $0x4] ss:$48 sps:$4 sm:$0xff]  }
  0x19   : > { %s2925_s21 = sshll.u32 %s433_s20, 3  ;;  %694 = vmatpush1.bf16.msra.mxu0 %v3278_v9  ;;  %817 = vmatpush1.bf16.msra.mxu1 %v3279_v10  ;;  %v3282_v12 = vld [vmem:[%s4056_s3 + $0x1c] ss:$48 sps:$4 sm:$0xff]   ;;  %v3284_v13 = vld [vmem:[%s4056_s3] ss:$48 sps:$4 sm:$0xff]   ;;  %v3455_v15 = vmov 0  }
  0x1a   : > { %s3584_s24 = scalar_lea.vmem %s4076_s0, %s2925_s21  ;;  %v3285_v14 = vld [vmem:[%s4056_s3 + $0x18] ss:$48 sps:$4 sm:$0xff]   ;;  %695 = vmatprep.subr.bf16.mxu0 %v3280_v11  ;;  %818 = vmatprep.subr.bf16.mxu1 %v3282_v12  ;;  %v3288_v16 = vld [vmem:[%s4056_s3 + $0x6c] ss:$48 sps:$4 sm:$0xff]   ;;  %v2926_v22 = vld [vmem:[%s4077_s1] ss:$0 sm:$0xff] }
  0x1b   : > { %v437_v0 = vld [vmem:[%s3584_s24] sm:$0xff]  ;;  %713 = vmatprep.mubr.bf16.mxu0 %v3455_v15  ;;  %836 = vmatprep.mubr.bf16.mxu1 %v3455_v15  ;;  %v3291_v17 = vld [vmem:[%s4056_s3 + $0x8c] ss:$48 sps:$4 sm:$0xff]   ;;  %v3286_v27 = vld [vmem:[%s4056_s3 + $0x68] ss:$48 sps:$4 sm:$0xff]   ;;  %v3673_v43 = vshrl.u32 %v498_v42, 7 }
  0x1c   : > { %v441_v1 = vsel %vm440_vm0, %v437_v0, 0.0  ;;  %v2927_v24 = vld [vmem:[%s4055_s2] ss:$0 sm:$0xff]  ;;  %v3289_v28 = vld [vmem:[%s4056_s3 + $0x88] ss:$48 sps:$4 sm:$0xff]   ;;  %v3456_v49 = vmov 0.0  }
  0x1d   : > { %442 = vadd.xlane.f32.xlu0 %v441_v1  ;;  %696 = vmatpush1.bf16.msra.mxu0 %v3284_v13  ;;  %v3294_v30 = vld [vmem:[%s4056_s3 + $0xc] ss:$48 sps:$4 sm:$0xff]   ;;  %v3292_v32 = vld [vmem:[%s4056_s3 + $0x8] ss:$48 sps:$4 sm:$0xff]   ;;  %v3300_v34 = vld [vmem:[%s4056_s3 + $0x74] ss:$48 sps:$4 sm:$0xff]  }
  0x1e   : > { %819 = vmatpush1.bf16.msra.mxu1 %v3285_v14  ;;  %734 = vmatprep.subr.bf16.mxu0 %v3288_v16  ;;  %v3297_v31 = vld [vmem:[%s4056_s3 + $0x2c] ss:$48 sps:$4 sm:$0xff]   ;;  %v3295_v33 = vld [vmem:[%s4056_s3 + $0x28] ss:$48 sps:$4 sm:$0xff]   ;;  %v3298_v35 = vld [vmem:[%s4056_s3 + $0x70] ss:$48 sps:$4 sm:$0xff]  }
  0x1f   : > { %898 = vmatprep.subr.bf16.mxu1 %v3291_v17  ;;  %v3303_v36 = vld [vmem:[%s4056_s3 + $0x14] ss:$48 sps:$4 sm:$0xff]   ;;  %v3301_v37 = vld [vmem:[%s4056_s3 + $0x10] ss:$48 sps:$4 sm:$0xff]   ;;  %v508_v44 = vsub.s32 2, %v3673_v43  ;;  %v512_v47 = vsub.s32 3, %v3673_v43 }
  0x20   : > { %v3306_v38 = vld [vmem:[%s4056_s3 + $0x84] ss:$48 sps:$4 sm:$0xff]   ;;  %v3304_v39 = vld [vmem:[%s4056_s3 + $0x80] ss:$48 sps:$4 sm:$0xff]   ;;  %v495_v45 = vld [vmem:[%s4057_s4 + $0x8] sm:$0xf] }
  0x21   : > { %v3309_v40 = vld [vmem:[%s4056_s3 + $0x24] ss:$48 sps:$4 sm:$0xff]   ;;  %v3307_v41 = vld [vmem:[%s4056_s3 + $0x20] ss:$48 sps:$4 sm:$0xff]   ;;  %v541_v46 = vrot.slane %v495_v45, %v508_v44  ;;  %v545_v48 = vrot.slane %v495_v45, %v512_v47  ;;  %vm3457_vm1 = vmmov 0   ;;  %v504_v50 = vsub.s32 1, %v3673_v43 }
  0x22   : > { %v516_v63 = vsub.s32 4, %v3673_v43  ;;  %v524_v7 = vsub.s32 6, %v3673_v43  ;;  %vm927_vm2 = vcmask 523264   ;;  %v528_v14 = vsub.s32 7, %v3673_v43  ;;  %s4068_s0 = smov 64  }
  0x23   : > { %v537_v51 = vrot.slane %v495_v45, %v504_v50  ;;  %vm1004_vm3 = vcmask 64512   ;;  %vm1260_vm4 = vcmask 1048064  }
  0xa6   : > { %v443_v2 = vpop.xlane.xlu0 %442 }
  0xa7   : > { %v445_v3 = vmul.f32 0.03125, %v443_v2 }
  0xa9   : > { %v446_v4 = vsub.f32 %v437_v0, %v445_v3  ;;  %v494_v3 = vld [vmem:[%s4057_s4] sm:$0xff] }
  0xaa   : > { %v517_v8 = vrot.slane %v494_v3, %v516_v63  ;;  %v525_v13 = vrot.slane %v494_v3, %v524_v7 }
  0xab   : > { %v447_v5 = vmul.f32 %v446_v4, %v446_v4 }
  0xad   : > { %v448_v6 = vsel %vm440_vm0, %v447_v5, 0.0 }
  0xae   : > { %449 = vadd.xlane.f32.xlu0 %v448_v6 }
 0x137   : > { %v450_v18 = vpop.xlane.xlu0 %449 }
 0x138   : > { %v451_v19 = vmul.f32 0.03125, %v450_v18 }
 0x13a   : > { %v452_v20 = vadd.f32 1e-06, %v451_v19 }
 0x13c   : > { %3352 = vrsqrt.f32 %v452_v20  ;;  %v529_v20 = vrot.slane %v494_v3, %v528_v14 }
 0x149   : > { %v3353_v21 = vpop.eup %3352 }
 0x14a   : > { %v454_v23 = vmul.f32 %v3353_v21, %v446_v4  ;;  %v500_v4 = vsub.s32 0, %v3673_v43 }
 0x14c   : > { %v461_v25 = vmul.f32 %v2926_v22, %v454_v23  ;;  %v501_v11 = vrot.slane %v494_v3, %v500_v4  ;;  %v533_v21 = vrot.slane %v495_v45, %v500_v4  ;;  %v509_v45 = vrot.slane %v494_v3, %v508_v44 }
 0x14e   : > { %v468_v26 = vadd.f32 %v2927_v24, %v461_v25 }
 0x150   : > { %v469_v29 = vpack.c.bf16 %v468_v26, %v468_v26 }
 0x152   : > { %2952 = vmatmul.mubr.msk.bf16.vlgmr.msra.gmra.mxu0 %vm440_vm0, %v469_v29  ;;  %2955 = vmatmul.mubr.msk.bf16.vlgmr.msra.gmra.mxu1 %vm440_vm0, %v469_v29 }
 0x153   : > { %735 = vmatpush1.bf16.msra.mxu0 %v3286_v27  ;;  %899 = vmatpush1.bf16.msra.mxu1 %v3289_v28 }
 0x154   : > { %736 = vmatprep.subr.bf16.mxu0 %v3294_v30  ;;  %900 = vmatprep.subr.bf16.mxu1 %v3297_v31 }
 0x155   : > { %754 = vmatprep.mubr.bf16.mxu0 %v3455_v15  ;;  %918 = vmatprep.mubr.bf16.mxu1 %v3455_v15 }
 0x157   : > { %737 = vmatpush1.bf16.msra.mxu0 %v3292_v32  ;;  %901 = vmatpush1.bf16.msra.mxu1 %v3295_v33 }
 0x158   : > { %775 = vmatprep.subr.bf16.mxu0 %v3300_v34  ;;  %3137 = vmatprep.subr.mxu1 %v3456_v49 }
 0x15a   : > { %2953 = vmatmul.mubr.msk.bf16.vlgmr.msra.gmra.mxu0 %vm440_vm0, %v469_v29  ;;  %2957 = vmatmul.mubr.msk.bf16.vlgmr.msra.gmra.mxu1 %vm440_vm0, %v469_v29 }
 0x15b   : > { %776 = vmatpush1.bf16.msra.mxu0 %v3298_v35  ;;  %795 = vmatprep.mubr.bf16.mxu0 %v3455_v15 }
 0x15c   : > { %777 = vmatprep.subr.bf16.mxu0 %v3303_v36  ;;  %3139 = vmatprep.mubr.msk.f32.mxu1 %vm3457_vm1, %v3456_v49 }
 0x15f   : > { %778 = vmatpush1.bf16.msra.mxu0 %v3301_v37 }
 0x160   : > { %857 = vmatprep.subr.bf16.mxu0 %v3306_v38  ;;  %v520_v38 = vsub.s32 5, %v3673_v43 }
 0x162   : > { %2954 = vmatmul.mubr.msk.bf16.vlgmr.msra.gmra.mxu0 %vm440_vm0, %v469_v29 }
 0x163   : > { %858 = vmatpush1.bf16.msra.mxu0 %v3304_v39  ;;  %877 = vmatprep.mubr.bf16.mxu0 %v3455_v15  ;;  %v521_v39 = vrot.slane %v494_v3, %v520_v38 }
 0x164   : > { %859 = vmatprep.subr.bf16.mxu0 %v3309_v40  ;;  %v505_v40 = vrot.slane %v494_v3, %v504_v50 }
 0x167   : > { %860 = vmatpush1.bf16.msra.mxu0 %v3307_v41 }
 0x168   : > { %3122 = vmatprep.subr.mxu0 %v3456_v49 }
 0x16a   : > { %2956 = vmatmul.mubr.msk.bf16.vlgmr.msra.gmra.mxu0 %vm440_vm0, %v469_v29 }
 0x16b   : > { %3124 = vmatprep.mubr.msk.f32.mxu0 %vm3457_vm1, %v3456_v49 }
 0x212   : > { %v715_v52 = vpop.f32.mrf.mxu0  ;;  %v838_v53 = vpop.f32.mrf.mxu1 }
 0x213   : > { %v716_v17 = vadd.f32 %v715_v52, %v501_v11  ;;  %v3713_v19 = vadd.f32 %v838_v53, %v525_v13 }
 0x214   : > { %v3693_v54 = vpop.f32.mrf.mxu0  ;;  %v840_v55 = vpop.f32.mrf.mxu1 }
 0x215   : > { %v3720_v24 = vadd.f32 %v840_v55, %v529_v20  ;;  %v718_v42 = vadd.f32 %v3693_v54, %v505_v40 }
 0x216   : > { %v719_v56 = vpop.f32.mrf.mxu0  ;;  %v842_v57 = vpop.f32.mrf.mxu1 }
 0x218   : > { %v720_v58 = vpop.f32.mrf.mxu0  ;;  %v843_v59 = vpop.f32.mrf.mxu1 }
 0x21a   : > { %v3695_v60 = vpop.f32.mrf.mxu0  ;;  %v920_v61 = vpop.f32.mrf.mxu1 }
 0x21b   : > { %v3697_v62 = vadd.f32 %v920_v61, %v541_v46  ;;  %v757_v46 = vadd.f32 %v3695_v60, %v509_v45 }
 0x21c   : > { %v3700_v0 = vpop.f32.mrf.mxu0  ;;  %v922_v1 = vpop.f32.mrf.mxu1 }
 0x21d   : > { %v3702_v2 = vadd.f32 %v922_v1, %v545_v48  ;;  %v513_v48 = vrot.slane %v494_v3, %v512_v47 }
 0x21e   : > { %v760_v5 = vpop.f32.mrf.mxu0  ;;  %v924_v6 = vpop.f32.mrf.mxu1 }
 0x220   : > { %v761_v9 = vpop.f32.mrf.mxu0  ;;  %v925_v10 = vpop.f32.mrf.mxu1 }
 0x222   : > { %v797_v12 = vpop.f32.mrf.mxu0 }
 0x223   : > { %v798_v15 = vadd.f32 %v797_v12, %v517_v8 }
 0x224   : > { %v799_v16 = vpop.f32.mrf.mxu0 }
 0x225   : > { %1092 = vrot.lane.b32.xlu0 %v798_v15, %s4068_s0  ;;  %3123 = vmatpush3.xpose.msk.msra.mxu0 %vm927_vm2, %v798_v15  ;;  %v800_v41 = vadd.f32 %v799_v16, %v521_v39 }
 0x226   : > { %v801_v18 = vpop.f32.mrf.mxu0  ;;  %3127 = vmatprep.subr.mxu0 %v3456_v49 }
 0x228   : > { %v802_v22 = vpop.f32.mrf.mxu0  ;;  %3125 = vmatmul.mubr.msk.f32.vlgmr.msra.gmra.mxu0 %vm927_vm2, %v716_v17 }
 0x229   : > { %1757 = vrot.lane.b32.xlu0 %v3713_v19, %s4068_s0  ;;  %3129 = vmatprep.mubr.msk.f32.mxu0 %vm3457_vm1, %v3456_v49 }
 0x22a   : > { %v879_v23 = vpop.f32.mrf.mxu0 }
 0x22b   : > { %v3722_v25 = vadd.f32 %v879_v23, %v533_v21 }
 0x22c   : > { %v881_v26 = vpop.f32.mrf.mxu0 }
 0x22d   : > { %v3724_v27 = vadd.f32 %v881_v26, %v537_v51  ;;  %2089 = vrot.lane.b32.xlu0 %v3720_v24, %s4068_s0  ;;  %3128 = vmatpush3.msra.mxu0 %v3722_v25  ;;  %v759_v51 = vadd.f32 %v3700_v0, %v513_v48 }
 0x22e   : > { %v883_v28 = vpop.f32.mrf.mxu0  ;;  %3132 = vmatprep.subr.mxu0 %v3456_v49 }
 0x230   : > { %v884_v29 = vpop.f32.mrf.mxu0 }
 0x297   : > { %v1093_v55 = vpop.permute.xlu0 %1092 }
 0x29b   : > { %v1758_v47 = vpop.permute.xlu0 %1757 }
 0x29f   : > { %v2090_v57 = vpop.permute.xlu0 %2089 }
 0x2e8   : > { %v1000_v30 = vpop.f32.mrf.mxu0 }
 0x2e9   : > { %v1005_v31 = vsel %vm1004_vm3, %v1000_v30, -inf }
 0x2ea   : > { %1006 = vmax.xlane.f32.xlu1 %v1005_v31  ;;  %v3126_v32 = vpop.f32.mrf.mxu0 }
 0x2fb   : > { %1090 = vrot.lane.b32.xlu1 %v716_v17, %s4068_s0 }
 0x373   : > { %v1007_v33 = vpop.xlane.xlu1 %1006 }
 0x374   : > { %v1008_v34 = vsub.f32 %v1000_v30, %v1007_v33 }
 0x376   : > { %v1009_v35 = vmul.f32 1.442695, %v1008_v34 }
 0x377   : > { %v1091_v50 = vpop.permute.xlu1 %1090 }
 0x378   : > { %3354 = vpow2.f32 %v1009_v35 }
 0x385   : > { %v3355_v36 = vpop.eup %3354 }
 0x386   : > { %v1011_v37 = vsel %vm1004_vm3, %v3355_v36, 0.0 }
 0x387   : > { %1012 = vadd.xlane.f32.xlu1 %v1011_v37 }
 0x398   : > { %1425 = vrot.lane.b32.xlu1 %v800_v41, %s4068_s0 }
 0x39c   : > { %1423 = vrot.lane.b32.xlu1 %v718_v42, %s4068_s0 }
 0x3a0   : > { %1755 = vrot.lane.b32.xlu1 %v757_v46, %s4068_s0 }
 0x3a4   : > { %2087 = vrot.lane.b32.xlu1 %v759_v51, %s4068_s0 }
 0x410   : > { %v1013_v52 = vpop.xlane.xlu1 %1012 }
 0x411   : > { %3356 = vrcp.f32 %v1013_v52 }
 0x414   : > { %v1426_v43 = vpop.permute.xlu1 %1425 }
 0x418   : > { %v1424_v44 = vpop.permute.xlu1 %1423 }
 0x41c   : > { %v1756_v56 = vpop.permute.xlu1 %1755 }
 0x41e   : > { %v3357_v53 = vpop.eup %3356 }
 0x41f   : > { %v1015_v54 = vmul.f32 %v3357_v53, %v3355_v36 }
 0x420   : > { %v2088_v58 = vpop.permute.xlu1 %2087 }
 0x421   : > { %3130 = vmatmul.mubr.msk.f32.vlgmr.msra.gmra.mxu0 %vm1004_vm3, %v1015_v54 }
 0x422   : > { %3133 = vmatpush3.xpose.msk.msra.mxu0 %vm927_vm2, %v1093_v55  ;;  %3134 = vmatprep.mubr.msk.f32.mxu0 %vm3457_vm1, %v3456_v49 }
 0x423   : > { %3142 = vmatprep.subr.mxu0 %v3456_v49 }
 0x425   : > { %3135 = vmatmul.mubr.msk.f32.vlgmr.msra.gmra.mxu0 %vm927_vm2, %v1091_v50 }
 0x426   : > { %3143 = vmatpush3.xpose.msk.msra.mxu0 %vm927_vm2, %v800_v41  ;;  %3144 = vmatprep.mubr.msk.f32.mxu0 %vm3457_vm1, %v3456_v49 }
 0x427   : > { %3152 = vmatprep.subr.mxu0 %v3456_v49 }
 0x429   : > { %3145 = vmatmul.mubr.msk.f32.vlgmr.msra.gmra.mxu0 %vm927_vm2, %v718_v42 }
 0x42a   : > { %3153 = vmatpush3.xpose.msk.msra.mxu0 %vm927_vm2, %v1426_v43  ;;  %3154 = vmatprep.mubr.msk.f32.mxu0 %vm3457_vm1, %v3456_v49 }
 0x42b   : > { %3162 = vmatprep.subr.mxu0 %v3456_v49 }
 0x42d   : > { %3155 = vmatmul.mubr.msk.f32.vlgmr.msra.gmra.mxu0 %vm927_vm2, %v1424_v44 }
 0x42e   : > { %3163 = vmatpush3.xpose.msk.msra.mxu0 %vm927_vm2, %v3713_v19  ;;  %3164 = vmatprep.mubr.msk.f32.mxu0 %vm3457_vm1, %v3456_v49 }
 0x42f   : > { %3172 = vmatprep.subr.mxu0 %v3456_v49 }
 0x431   : > { %3165 = vmatmul.mubr.msk.f32.vlgmr.msra.gmra.mxu0 %vm927_vm2, %v757_v46 }
 0x432   : > { %3173 = vmatpush3.xpose.msk.msra.mxu0 %vm927_vm2, %v1758_v47  ;;  %3174 = vmatprep.mubr.msk.f32.mxu0 %vm3457_vm1, %v3456_v49 }
 0x433   : > { %3182 = vmatprep.subr.mxu0 %v3456_v49 }
 0x435   : > { %3175 = vmatmul.mubr.msk.f32.vlgmr.msra.gmra.mxu0 %vm927_vm2, %v1756_v56 }
 0x436   : > { %3183 = vmatpush3.xpose.msk.msra.mxu0 %vm927_vm2, %v3720_v24  ;;  %3184 = vmatprep.mubr.msk.f32.mxu0 %vm3457_vm1, %v3456_v49 }
 0x437   : > { %3192 = vmatprep.subr.mxu0 %v3456_v49 }
 0x439   : > { %3185 = vmatmul.mubr.msk.f32.vlgmr.msra.gmra.mxu0 %vm927_vm2, %v759_v51 }
 0x43a   : > { %3193 = vmatpush3.xpose.msk.msra.mxu0 %vm927_vm2, %v2090_v57  ;;  %3194 = vmatprep.mubr.msk.f32.mxu0 %vm3457_vm1, %v3456_v49 }
 0x43d   : > { %3195 = vmatmul.mubr.msk.f32.vlgmr.msra.gmra.mxu0 %vm927_vm2, %v2088_v58 }
 0x4e1   : > { %v1085_v59 = vpop.f32.mrf.mxu0 }
 0x4e2   : > { %1089 = vst.msk [vmem:[#allocation2] sm:$0xff] %vm927_vm2, %v1085_v59 }
 0x4e3   : > { %v3131_v60 = vpop.f32.mrf.mxu0 }
 0x4e5   : > { %v1164_v61 = vpop.f32.mrf.mxu0 }
 0x4e6   : > { %v1168_v63 = vsel %vm1004_vm3, %v1164_v61, -inf }
 0x4e7   : > { %1169 = vmax.xlane.f32.xlu0 %v1168_v63  ;;  %v3136_v0 = vpop.f32.mrf.mxu0 }
 0x4e9   : > { %v1334_v1 = vpop.f32.mrf.mxu0 }
 0x4ea   : > { %v1338_v3 = vsel %vm1004_vm3, %v1334_v1, -inf }
 0x4eb   : > { %1339 = vmax.xlane.f32.xlu1 %v1338_v3  ;;  %v3146_v4 = vpop.f32.mrf.mxu0 }
 0x4ed   : > { %v1497_v5 = vpop.f32.mrf.mxu0 }
 0x4ee   : > { %v1501_v6 = vsel %vm1004_vm3, %v1497_v5, -inf }
 0x4ef   : > { %1502 = vmax.xlane.f32.xlu0 %v1501_v6  ;;  %v3156_v7 = vpop.f32.mrf.mxu0 }
 0x4f1   : > { %v1666_v8 = vpop.f32.mrf.mxu0 }
 0x4f2   : > { %v1670_v9 = vsel %vm1004_vm3, %v1666_v8, -inf }
 0x4f3   : > { %1671 = vmax.xlane.f32.xlu0 %v1670_v9  ;;  %v3166_v10 = vpop.f32.mrf.mxu0 }
 0x4f5   : > { %v1829_v11 = vpop.f32.mrf.mxu0 }
 0x4f6   : > { %v1833_v12 = vsel %vm1004_vm3, %v1829_v11, -inf }
 0x4f7   : > { %1834 = vmax.xlane.f32.xlu0 %v1833_v12  ;;  %v3176_v13 = vpop.f32.mrf.mxu0 }
 0x4f9   : > { %v1998_v14 = vpop.f32.mrf.mxu0 }
 0x4fa   : > { %v2002_v15 = vsel %vm1004_vm3, %v1998_v14, -inf }
 0x4fb   : > { %2003 = vmax.xlane.f32.xlu1 %v2002_v15  ;;  %v3186_v16 = vpop.f32.mrf.mxu0 }
 0x4fd   : > { %v2161_v17 = vpop.f32.mrf.mxu0 }
 0x4fe   : > { %v2165_v18 = vsel %vm1004_vm3, %v2161_v17, -inf }
 0x4ff   : > { %2166 = vmax.xlane.f32.xlu0 %v2165_v18  ;;  %v3196_v19 = vpop.f32.mrf.mxu0  ;;  %v3311_v18 = vld [vmem:[%s4058_s5 + $0x38] sm:$0xff]  }
 0x500   : > { %v3312_v19 = vld [vmem:[%s4058_s5 + $0x70] sm:$0xff]  }
 0x570   : > { %v1170_v20 = vpop.xlane.xlu0 %1169 }
 0x571   : > { %v1171_v21 = vsub.f32 %v1164_v61, %v1170_v20  ;;  %v3313_v20 = vld [vmem:[%s4058_s5 + $0x30] sm:$0xff]  }
 0x573   : > { %v1172_v22 = vmul.f32 1.442695, %v1171_v21  ;;  %v3314_v21 = vld [vmem:[%s4058_s5 + $0x68] sm:$0xff]  }
 0x574   : > { %v1340_v23 = vpop.xlane.xlu1 %1339 }
 0x575   : > { %3358 = vpow2.f32 %v1172_v22  ;;  %v1341_v24 = vsub.f32 %v1334_v1, %v1340_v23  ;;  %v3315_v22 = vld [vmem:[%s4058_s5 + $0x28] sm:$0xff]   ;;  %v3316_v23 = vld [vmem:[%s4058_s5 + $0x60] sm:$0xff]  }
 0x577   : > { %v1342_v26 = vmul.f32 1.442695, %v1341_v24  ;;  %v3317_v24 = vld [vmem:[%s4058_s5 + $0x20] sm:$0xff]  }
 0x578   : > { %v1503_v28 = vpop.xlane.xlu0 %1502 }
 0x579   : > { %3360 = vpow2.f32 %v1342_v26  ;;  %v1504_v29 = vsub.f32 %v1497_v5, %v1503_v28  ;;  %v3318_v26 = vld [vmem:[%s4058_s5 + $0x58] sm:$0xff]  }
 0x57a   : > { %v3319_v28 = vld [vmem:[%s4058_s5 + $0x18] sm:$0xff]  }
 0x57b   : > { %v1505_v30 = vmul.f32 1.442695, %v1504_v29  ;;  %v3320_v29 = vld [vmem:[%s4058_s5 + $0x50] sm:$0xff]  }
 0x57c   : > { %v1672_v31 = vpop.xlane.xlu0 %1671 }
 0x57d   : > { %3362 = vpow2.f32 %v1505_v30  ;;  %v1673_v32 = vsub.f32 %v1666_v8, %v1672_v31  ;;  %v3321_v30 = vld [vmem:[%s4058_s5 + $0x10] sm:$0xff]   ;;  %v3322_v31 = vld [vmem:[%s4058_s5 + $0x48] sm:$0xff]  }
 0x57f   : > { %v1674_v33 = vmul.f32 1.442695, %v1673_v32  ;;  %v3323_v32 = vld [vmem:[%s4058_s5 + $0x8] sm:$0xff]  }
 0x580   : > { %v1835_v34 = vpop.xlane.xlu0 %1834 }
 0x581   : > { %3364 = vpow2.f32 %v1674_v33  ;;  %v1836_v35 = vsub.f32 %v1829_v11, %v1835_v34  ;;  %v3324_v33 = vld [vmem:[%s4058_s5 + $0x40] sm:$0xff]  }
 0x582   : > { %v3359_v36 = vpop.eup %3358 }
 0x583   : > { %v1837_v37 = vmul.f32 1.442695, %v1836_v35  ;;  %v1174_v38 = vsel %vm1004_vm3, %v3359_v36, 0.0 }
 0x584   : > { %1175 = vadd.xlane.f32.xlu1 %v1174_v38  ;;  %v2004_v39 = vpop.xlane.xlu1 %2003 }
 0x585   : > { %3366 = vpow2.f32 %v1837_v37  ;;  %v2005_v40 = vsub.f32 %v1998_v14, %v2004_v39  ;;  %v3326_v39 = vld [vmem:[%s4058_s5 + $0xf8] sm:$0xff]  }
 0x586   : > { %v3361_v41 = vpop.eup %3360 }
 0x587   : > { %v2006_v42 = vmul.f32 1.442695, %v2005_v40  ;;  %v1344_v45 = vsel %vm1004_vm3, %v3361_v41, 0.0  ;;  %v3327_v40 = vld [vmem:[%s4058_s5 + $0xb8] sm:$0xff]  }
 0x588   : > { %1345 = vadd.xlane.f32.xlu0 %v1344_v45  ;;  %v2167_v43 = vpop.xlane.xlu0 %2166 }
 0x589   : > { %3368 = vpow2.f32 %v2006_v42  ;;  %v2168_v44 = vsub.f32 %v2161_v17, %v2167_v43  ;;  %v3333_v43 = vld [vmem:[%s4058_s5 + $0xa0] sm:$0xff]  }
 0x58a   : > { %v3363_v46 = vpop.eup %3362 }
 0x58b   : > { %v1507_v48 = vsel %vm1004_vm3, %v3363_v46, 0.0  ;;  %v2169_v47 = vmul.f32 1.442695, %v2168_v44  ;;  %v3334_v44 = vld [vmem:[%s4058_s5 + $0xd8] sm:$0xff]  }
 0x58c   : > { %1508 = vadd.xlane.f32.xlu1 %v1507_v48  ;;  %v3330_v48 = vld [vmem:[%s4058_s5 + $0xe8] sm:$0xff]  }
 0x58d   : > { %3370 = vpow2.f32 %v2169_v47 }
 0x58e   : > { %v3365_v51 = vpop.eup %3364 }
 0x58f   : > { %v1676_v50 = vsel %vm1004_vm3, %v3365_v51, 0.0 }
 0x590   : > { %1677 = vadd.xlane.f32.xlu0 %v1676_v50 }
 0x592   : > { %v3367_v52 = vpop.eup %3366 }
 0x593   : > { %v1839_v53 = vsel %vm1004_vm3, %v3367_v52, 0.0 }
 0x594   : > { %1840 = vadd.xlane.f32.xlu1 %v1839_v53  ;;  %v3332_v53 = vld [vmem:[%s4058_s5 + $0xe0] sm:$0xff]  }
 0x596   : > { %v3369_v54 = vpop.eup %3368 }
 0x597   : > { %v2008_v55 = vsel %vm1004_vm3, %v3369_v54, 0.0 }
 0x598   : > { %2009 = vadd.xlane.f32.xlu0 %v2008_v55 }
 0x59a   : > { %v3371_v56 = vpop.eup %3370 }
 0x59b   : > { %v2171_v57 = vsel %vm1004_vm3, %v3371_v56, 0.0 }
 0x5a5   : > { %1513 = vrot.lane.b32.xlu1 %v3724_v27, %s4068_s0 }
 0x5a9   : > { %1845 = vrot.lane.b32.xlu1 %v3697_v62, %s4068_s0 }
 0x5ae   : > { %1180 = vrot.lane.b32.xlu0 %v3722_v25, %s4068_s0 }
 0x5cd   : > { %2172 = vadd.xlane.f32.xlu1 %v2171_v57  ;;  %v3335_v57 = vld [vmem:[%s4058_s5 + $0x98] sm:$0xff]  }
 0x5de   : > { %2177 = vrot.lane.b32.xlu1 %v3702_v2, %s4068_s0  ;;  %s3460_s0 = smov [#allocation3]  }
 0x60d   : > { %v1176_v58 = vpop.xlane.xlu1 %1175 }
 0x60e   : > { %3372 = vrcp.f32 %v1176_v58  ;;  %v3336_v58 = vld [vmem:[%s4058_s5 + $0xd0] sm:$0xff]  }
 0x611   : > { %v1346_v59 = vpop.xlane.xlu0 %1345 }
 0x612   : > { %3374 = vrcp.f32 %v1346_v59  ;;  %v3337_v59 = vld [vmem:[%s4058_s5 + $0x90] sm:$0xff]  }
 0x615   : > { %v1509_v60 = vpop.xlane.xlu1 %1508 }
 0x616   : > { %3376 = vrcp.f32 %v1509_v60  ;;  %v3338_v60 = vld [vmem:[%s4058_s5 + $0xc8] sm:$0xff]  }
 0x619   : > { %v1678_v61 = vpop.xlane.xlu0 %1677 }
 0x61a   : > { %3378 = vrcp.f32 %v1678_v61  ;;  %v3339_v61 = vld [vmem:[%s4058_s5 + $0x88] sm:$0xff]  }
 0x61b   : > { %v3373_v63 = vpop.eup %3372 }
 0x61c   : > { %v1178_v3 = vmul.f32 %v3373_v63, %v3359_v36  ;;  %v3325_v36 = vld [vmem:[%s4058_s5] sm:$0xff]  }
 0x61d   : > { %v1841_v0 = vpop.xlane.xlu1 %1840  ;;  %v3341_v63 = vld [vmem:[%s4058_s5 + $0x80] sm:$0xff]  }
 0x61e   : > { %3380 = vrcp.f32 %v1841_v0 }
 0x61f   : > { %v3375_v4 = vpop.eup %3374 }
 0x620   : > { %v1348_v5 = vmul.f32 %v3375_v4, %v3361_v41  ;;  %v3328_v41 = vld [vmem:[%s4058_s5 + $0xf0] sm:$0xff]  }
 0x621   : > { %v2010_v25 = vpop.xlane.xlu0 %2009  ;;  %v1514_v7 = vpop.permute.xlu1 %1513 }
 0x622   : > { %3382 = vrcp.f32 %v2010_v25  ;;  %v3340_v25 = vld [vmem:[%s4058_s5 + $0xc0] sm:$0xff]  }
 0x623   : > { %v3377_v6 = vpop.eup %3376 }
 0x624   : > { %v1511_v8 = vmul.f32 %v3377_v6, %v3363_v46  ;;  %v3329_v46 = vld [vmem:[%s4058_s5 + $0xb0] sm:$0xff]  }
 0x625   : > { %v1181_v1 = vpop.permute.xlu0 %1180  ;;  %v1846_v11 = vpop.permute.xlu1 %1845 }
 0x626   : > { %3138 = vmatpush3.msra.mxu1 %v1181_v1 }
 0x627   : > { %3140 = vmatmul.mubr.msk.f32.vlgmr.msra.gmra.mxu1 %vm1004_vm3, %v1178_v3  ;;  %3147 = vmatprep.subr.mxu1 %v3456_v49  ;;  %v3379_v9 = vpop.eup %3378 }
 0x628   : > { %3148 = vmatpush3.msra.mxu1 %v3724_v27  ;;  %3149 = vmatprep.mubr.msk.f32.mxu1 %vm3457_vm1, %v3456_v49  ;;  %v1680_v27 = vmul.f32 %v3379_v9, %v3365_v51 }
 0x629   : > { %3157 = vmatprep.subr.mxu1 %v3456_v49 }
 0x62b   : > { %3150 = vmatmul.mubr.msk.f32.vlgmr.msra.gmra.mxu1 %vm1004_vm3, %v1348_v5  ;;  %v3381_v10 = vpop.eup %3380 }
 0x62c   : > { %3158 = vmatpush3.msra.mxu1 %v1514_v7  ;;  %3159 = vmatprep.mubr.msk.f32.mxu1 %vm3457_vm1, %v3456_v49  ;;  %v1843_v12 = vmul.f32 %v3381_v10, %v3367_v52  ;;  %v3331_v52 = vld [vmem:[%s4058_s5 + $0xa8] sm:$0xff]  }
 0x62d   : > { %3167 = vmatprep.subr.mxu1 %v3456_v49 }
 0x62f   : > { %3160 = vmatmul.mubr.msk.f32.vlgmr.msra.gmra.mxu1 %vm1004_vm3, %v1511_v8  ;;  %v3383_v13 = vpop.eup %3382 }
 0x630   : > { %3168 = vmatpush3.msra.mxu1 %v3697_v62  ;;  %3169 = vmatprep.mubr.msk.f32.mxu1 %vm3457_vm1, %v3456_v49  ;;  %v2012_v62 = vmul.f32 %v3383_v13, %v3369_v54 }
 0x631   : > { %3177 = vmatprep.subr.mxu1 %v3456_v49 }
 0x633   : > { %3170 = vmatmul.mubr.msk.f32.vlgmr.msra.gmra.mxu1 %vm1004_vm3, %v1680_v27 }
 0x634   : > { %3178 = vmatpush3.msra.mxu1 %v1846_v11  ;;  %3179 = vmatprep.mubr.msk.f32.mxu1 %vm3457_vm1, %v3456_v49 }
 0x635   : > { %3187 = vmatprep.subr.mxu1 %v3456_v49 }
 0x637   : > { %3180 = vmatmul.mubr.msk.f32.vlgmr.msra.gmra.mxu1 %vm1004_vm3, %v1843_v12 }
 0x638   : > { %3188 = vmatpush3.msra.mxu1 %v3702_v2  ;;  %3189 = vmatprep.mubr.msk.f32.mxu1 %vm3457_vm1, %v3456_v49  ;;  %v3310_v2 = vld [vmem:[%s4058_s5 + $0x78] sm:$0xff]  }
 0x639   : > { %3197 = vmatprep.subr.mxu1 %v3456_v49  ;;  %3066 = vmatprep.subr.bf16.mxu0 %v3310_v2  ;;  %v2982_v2 = vld [vmem:[%s4059_s6] ss:$0 sm:$0xff] }
 0x63a   : > { %3067 = vmatpush3.bf16.msra.mxu0 %v3311_v18 }
 0x63b   : > { %3190 = vmatmul.mubr.msk.f32.vlgmr.msra.gmra.mxu1 %vm1004_vm3, %v2012_v62  ;;  %3068 = vmatprep.subr.bf16.mxu0 %v3312_v19 }
 0x63c   : > { %3199 = vmatprep.mubr.msk.f32.mxu1 %vm3457_vm1, %v3456_v49 }
 0x63e   : > { %3069 = vmatpush3.bf16.msra.mxu0 %v3313_v20 }
 0x63f   : > { %3070 = vmatprep.subr.bf16.mxu0 %v3314_v21 }
 0x642   : > { %3071 = vmatpush3.bf16.msra.mxu0 %v3315_v22 }
 0x643   : > { %3072 = vmatprep.subr.bf16.mxu0 %v3316_v23 }
 0x646   : > { %3073 = vmatpush3.bf16.msra.mxu0 %v3317_v24 }
 0x647   : > { %3074 = vmatprep.subr.bf16.mxu0 %v3318_v26  ;;  %v3392_v26 = vld [vmem:[%s3584_s24] sm:$0xff]  ;;  %s429_s24 = sand.u32 1, %s3445_s26  }
 0x648   : > { %s2924_s22 = sshll.u32 %s429_s24, 3  ;;  %s2848_s29 = scalar_lea.sflag [#allocation4], %s429_s24 }
 0x649   : > { %s431_s15 = scalar_lea.vmem [#allocation3], %s2924_s22  ;;  %s3397_s22 = sshll.u32 %s3460_s0, 4  ;;  %s3398_s22 = int_to_ptr.vmem [resolvable:$false] %s3397_s22 }
 0x64a   : > { %3075 = vmatpush3.bf16.msra.mxu0 %v3319_v28  ;;  %s2861_s16 = sshll.u32 %s431_s15, 4  ;;  %s3399_s17 = scalar_lea.vmem %s3398_s22, 256  ;;  %s4013_s16 = int_to_ptr.vmem [resolvable:$true] %s2861_s16 }
 0x64b   : > { %3076 = vmatprep.subr.bf16.mxu0 %v3320_v29  ;;  %s3393_s21 = scalar_lea.vmem %s4013_s16, 128  ;;  %p3400_p0 = scmp.lt.s32.totalorder %s4013_s16, %s3398_s22 }
 0x64c   : > { %p3394_p11 = scmp.ne.s32.totalorder %s4013_s16, %s3393_s21  ;;  %p3401_p1 = scmp.lt.s32.totalorder %s3399_s17, %s3393_s21 }
 0x64e   : > { %3077 = vmatpush3.bf16.msra.mxu0 %v3321_v30  ;;  %p3395_p12 = pnand %p3394_p11, %p3569_p5  ;;  %p3402_p2 = por %p3401_p1, %p3400_p0 }
 0x64f   : > { %3078 = vmatprep.subr.bf16.mxu0 %v3322_v31 }
 0x650   : > { %p3396_p13 = pneg %p3395_p12 }
 0x652   : > { %3079 = vmatpush3.bf16.msra.mxu0 %v3323_v32  ;;  %p3403_p3 = pnand %p3402_p2, %p3396_p13 }
 0x653   : > { %3080 = vmatprep.subr.bf16.mxu0 %v3324_v33 }
 0x656   : > { %v2173_v14 = vpop.xlane.xlu1 %2172  ;;  %3081 = vmatpush3.bf16.msra.mxu0 %v3325_v36  ;;  %v3343_v36 = vld [vmem:[%s4062_s9] sm:$0xff]  }
 0x657   : > { %3384 = vrcp.f32 %v2173_v14  ;;  %3202 = vmatprep.subr.bf16.mxu0 %v3456_v49 }
 0x65a   : > { %v2178_v15 = vpop.permute.xlu1 %2177 }
 0x65b   : > { %3198 = vmatpush3.msra.mxu1 %v2178_v15 }
 0x65c   : > { %3088 = vmatprep.subr.bf16.mxu1 %v3326_v39 }
 0x664   : > { %v3385_v16 = vpop.eup %3384 }
 0x665   : > { %v2175_v17 = vmul.f32 %v3385_v16, %v3371_v56 }
 0x667   : > { %3200 = vmatmul.mubr.msk.f32.vlgmr.msra.gmra.mxu1 %vm1004_vm3, %v2175_v17 }
 0x668   : > { %3089 = vmatpush3.bf16.msra.mxu1 %v3327_v40 }
 0x669   : > { %3090 = vmatprep.subr.bf16.mxu1 %v3328_v41  ;;  %v3015_v41 = vld [vmem:[%s4060_s7] ss:$0 sm:$0xff] }
 0x66c   : > { %3091 = vmatpush3.bf16.msra.mxu1 %v3329_v46 }
 0x66d   : > { %3092 = vmatprep.subr.bf16.mxu1 %v3330_v48 }
 0x670   : > { %3093 = vmatpush3.bf16.msra.mxu1 %v3331_v52  ;;  %v3345_v52 = vld [vmem:[%s4064_s11 + $0x30] sm:$0xff]  }
 0x671   : > { %3094 = vmatprep.subr.bf16.mxu1 %v3332_v53  ;;  %v3346_v53 = vld [vmem:[%s4064_s11 + $0x28] sm:$0xff]  }
 0x674   : > { %3095 = vmatpush3.bf16.msra.mxu1 %v3333_v43  ;;  %v3349_v43 = vld [vmem:[%s4064_s11 + $0x10] sm:$0xff]  }
 0x675   : > { %3096 = vmatprep.subr.bf16.mxu1 %v3334_v44  ;;  %v3350_v44 = vld [vmem:[%s4064_s11 + $0x8] sm:$0xff]  }
 0x678   : > { %3097 = vmatpush3.bf16.msra.mxu1 %v3335_v57 }
 0x679   : > { %3098 = vmatprep.subr.bf16.mxu1 %v3336_v58 }
 0x67c   : > { %3099 = vmatpush3.bf16.msra.mxu1 %v3337_v59 }
 0x67d   : > { %3100 = vmatprep.subr.bf16.mxu1 %v3338_v60 }
 0x680   : > { %3101 = vmatpush3.bf16.msra.mxu1 %v3339_v61 }
 0x681   : > { %3102 = vmatprep.subr.bf16.mxu1 %v3340_v25 }
 0x684   : > { %3103 = vmatpush3.bf16.msra.mxu1 %v3341_v63 }
 0x685   : > { %3210 = vmatprep.subr.bf16.mxu1 %v3456_v49 }
 0x6e7   : > { %v1252_v34 = vpop.f32.mrf.mxu1 }
 0x6e8   : > { %1257 = vrot.lane.b32.xlu1 %v1252_v34, %s4078_s27 }
 0x6e9   : > { %v3141_v35 = vpop.f32.mrf.mxu1 }
 0x6ea   : > { %v3342_v35 = vld [vmem:[%s4062_s9 + $0x8] sm:$0xff]  }
 0x6eb   : > { %v1418_v37 = vpop.f32.mrf.mxu1 }
 0x6ec   : > { %1422 = vst.msk [vmem:[#allocation2 + $0x8] sm:$0xff] %vm927_vm2, %v1418_v37 }
 0x6ed   : > { %v3151_v38 = vpop.f32.mrf.mxu1 }
 0x6ef   : > { %v1585_v42 = vpop.f32.mrf.mxu1 }
 0x6f0   : > { %1590 = vrot.lane.b32.xlu0 %v1585_v42, %s4078_s27 }
 0x6f1   : > { %v3161_v45 = vpop.f32.mrf.mxu1 }
 0x6f2   : > { %v3016_v45 = vld [vmem:[%s4061_s8] ss:$0 sm:$0xff] }
 0x6f3   : > { %v1750_v51 = vpop.f32.mrf.mxu1 }
 0x6f4   : > { %1754 = vst.msk [vmem:[#allocation2 + $0x10] sm:$0xff] %vm927_vm2, %v1750_v51 }
 0x6f5   : > { %v3171_v50 = vpop.f32.mrf.mxu1 }
 0x6f6   : > { %v3344_v50 = vld [vmem:[%s4064_s11 + $0x38] sm:$0xff]  }
 0x6f7   : > { %v1917_v54 = vpop.f32.mrf.mxu1 }
 0x6f8   : > { %1922 = vrot.lane.b32.xlu1 %v1917_v54, %s4078_s27  ;;  %v3347_v54 = vld [vmem:[%s4064_s11 + $0x20] sm:$0xff]  }
 0x6f9   : > { %v3181_v55 = vpop.f32.mrf.mxu1 }
 0x6fa   : > { %v3348_v55 = vld [vmem:[%s4064_s11 + $0x18] sm:$0xff]  }
 0x6fb   : > { %v2082_v47 = vpop.f32.mrf.mxu1 }
 0x6fc   : > { %2086 = vst.msk [vmem:[#allocation2 + $0x18] sm:$0xff] %vm927_vm2, %v2082_v47  ;;  %v3351_v47 = vld [vmem:[%s4064_s11] sm:$0xff]  }
 0x6fd   : > { %v3191_v56 = vpop.f32.mrf.mxu1 }
 0x6fe   : > { %v3017_v56 = vld [vmem:[%s4063_s10] ss:$0 sm:$0xff] }
 0x727   : > { %v2249_v0 = vpop.f32.mrf.mxu1 }
 0x728   : > { %2254 = vrot.lane.b32.xlu0 %v2249_v0, %s4078_s27  ;;  %s4011_s27 = scalar_lea.hbm %s4066_s13, %s3031_s30 }
 0x729   : > { %v3201_v1 = vpop.f32.mrf.mxu1 }
 0x75a   : > { %v1258_v3 = vpop.permute.xlu1 %1257 }
 0x75b   : > { %1261 = vst.msk [vmem:[#allocation2] sm:$0xff] %vm1260_vm4, %v1258_v3 }
 0x762   : > { %v1591_v4 = vpop.permute.xlu0 %1590  ;;  %v2258_v5 = vld [vmem:[#allocation2] sm:$0xff] }
 0x763   : > { %1593 = vst.msk [vmem:[#allocation2 + $0x8] sm:$0xff] %vm1260_vm4, %v1591_v4  ;;  %v2262_v9 = vpack.c.bf16 %v2258_v5, %v2258_v5 }
 0x76a   : > { %v1923_v6 = vpop.permute.xlu1 %1922  ;;  %v2259_v7 = vld [vmem:[#allocation2 + $0x8] sm:$0xff] }
 0x76b   : > { %1925 = vst.msk [vmem:[#allocation2 + $0x10] sm:$0xff] %vm1260_vm4, %v1923_v6  ;;  %v2263_v8 = vpack.c.bf16 %v2259_v7, %v2259_v7 }
 0x76d   : > { %2561 = vmatprep.mubr.bf16.mxu0 %v2263_v8 }
 0x76e   : > { %2562 = vmatmul.mubr.bf16.vlgmr.msra.gmra.mxu0 %v2262_v9 }
 0x76f   : > { %3206 = vmatprep.mubr.msk.bf16.mxu0 %vm3457_vm1, %v3456_v49  ;;  %3203 = vmatpush3.bf16.msra.mxu0 %v3342_v35 }
 0x770   : > { %3204 = vmatprep.subr.bf16.mxu0 %v3456_v49 }
 0x772   : > { %v2260_v10 = vld [vmem:[#allocation2 + $0x10] sm:$0xff] }
 0x773   : > { %v2264_v13 = vpack.c.bf16 %v2260_v10, %v2260_v10  ;;  %3205 = vmatpush3.bf16.msra.mxu0 %v3343_v36 }
 0x79a   : > { %v2255_v27 = vpop.permute.xlu0 %2254 }
 0x79b   : > { %2257 = vst.msk [vmem:[#allocation2 + $0x18] sm:$0xff] %vm1260_vm4, %v2255_v27 }
 0x7a2   : > { %v2261_v11 = vld [vmem:[#allocation2 + $0x18] sm:$0xff] }
 0x7a3   : > { %v2265_v12 = vpack.c.bf16 %v2261_v11, %v2261_v11 }
 0x7a5   : > { %2601 = vmatprep.mubr.bf16.mxu1 %v2265_v12 }
 0x7a6   : > { %2602 = vmatmul.mubr.bf16.vlgmr.msra.gmra.mxu1 %v2264_v13 }
 0x7a7   : > { %3226 = vmatprep.mubr.msk.bf16.mxu1 %vm3457_vm1, %v3456_v49  ;;  %3211 = vmatpush3.bf16.msra.mxu1 %v3344_v50 }
 0x7a8   : > { %3212 = vmatprep.subr.bf16.mxu1 %v3456_v49 }
 0x7ab   : > { %3213 = vmatpush3.bf16.msra.mxu1 %v3345_v52 }
 0x7ac   : > { %3214 = vmatprep.subr.bf16.mxu1 %v3456_v49 }
 0x7af   : > { %3215 = vmatpush3.bf16.msra.mxu1 %v3346_v53 }
 0x7b0   : > { %3216 = vmatprep.subr.bf16.mxu1 %v3456_v49 }
 0x7b3   : > { %3217 = vmatpush3.bf16.msra.mxu1 %v3347_v54 }
 0x7b4   : > { %3218 = vmatprep.subr.bf16.mxu1 %v3456_v49 }
 0x7b7   : > { %3219 = vmatpush3.bf16.msra.mxu1 %v3348_v55 }
 0x7b8   : > { %3220 = vmatprep.subr.bf16.mxu1 %v3456_v49 }
 0x7bb   : > { %3221 = vmatpush3.bf16.msra.mxu1 %v3349_v43 }
 0x7bc   : > { %3222 = vmatprep.subr.bf16.mxu1 %v3456_v49 }
 0x7bf   : > { %3223 = vmatpush3.bf16.msra.mxu1 %v3350_v44 }
 0x7c0   : > { %3224 = vmatprep.subr.bf16.mxu1 %v3456_v49 }
 0x7c3   : > { %3225 = vmatpush3.bf16.msra.mxu1 %v3351_v47 }
 0x82e   : > { %v3082_v62 = vpop.f32.mrf.mxu0 }
 0x830   : > { %v3083_v14 = vpop.f32.mrf.mxu0 }
 0x831   : > { %v3084_v17 = vadd.f32 %v3083_v14, %v3082_v62 }
 0x832   : > { %v3085_v15 = vpop.f32.mrf.mxu0 }
 0x833   : > { %v2564_v20 = vadd.f32 %v3084_v17, %v2982_v2 }
 0x834   : > { %v3086_v16 = vpop.f32.mrf.mxu0 }
 0x835   : > { %v3459_v16 = vmov -1.0  }
 0x866   : > { %v3104_v18 = vpop.f32.mrf.mxu1 }
 0x868   : > { %v3105_v19 = vpop.f32.mrf.mxu1 }
 0x869   : > { %v3106_v21 = vadd.f32 %v3105_v19, %v3104_v18 }
 0x86a   : > { %v3107_v22 = vpop.f32.mrf.mxu1 }
 0x86b   : > { %v2604_v23 = vadd.f32 %v3106_v21, %v2564_v20  ;;  %v3021_v22 = vld [vmem:[%s4065_s12] ss:$0 sm:$0xff] }
 0x86c   : > { %v3108_v24 = vpop.f32.mrf.mxu1 }
 0x86d   : > { %v3948_v28 = vadd.f32 %v3392_v26, %v2604_v23 }
 0x86f   : > { %v2612_v29 = vsel %vm440_vm0, %v3948_v28, 0.0 }
 0x870   : > { %2613 = vadd.xlane.f32.xlu0 %v2612_v29 }
 0x8f9   : > { %v2614_v30 = vpop.xlane.xlu0 %2613 }
 0x8fa   : > { %v2615_v31 = vmul.f32 0.03125, %v2614_v30 }
 0x8fc   : > { %v2616_v32 = vsub.f32 %v3948_v28, %v2615_v31 }
 0x8fe   : > { %v2617_v33 = vmul.f32 %v2616_v32, %v2616_v32 }
 0x900   : > { %v2618_v34 = vsel %vm440_vm0, %v2617_v33, 0.0 }
 0x901   : > { %2619 = vadd.xlane.f32.xlu1 %v2618_v34 }
 0x98a   : > { %v2620_v37 = vpop.xlane.xlu1 %2619 }
 0x98b   : > { %v2621_v38 = vmul.f32 0.03125, %v2620_v37 }
 0x98d   : > { %v2622_v39 = vadd.f32 1e-06, %v2621_v38 }
 0x98f   : > { %3386 = vrsqrt.f32 %v2622_v39 }
 0x99c   : > { %v3387_v40 = vpop.eup %3386 }
 0x99d   : > { %v2624_v42 = vmul.f32 %v3387_v40, %v2616_v32 }
 0x99f   : > { %v2631_v46 = vmul.f32 %v3015_v41, %v2624_v42 }
 0x9a1   : > { %v2638_v48 = vadd.f32 %v3016_v45, %v2631_v46 }
 0x9a3   : > { %v2639_v51 = vpack.c.bf16 %v2638_v48, %v2638_v48 }
 0x9a5   : > { %3207 = vmatmul.mubr.msk.bf16.vlgmr.msra.gmra.mxu0 %vm440_vm0, %v2639_v51 }
 0xa65   : > { %v2700_v57 = vpop.f32.mrf.mxu0 }
 0xa66   : > { %v2701_v58 = vadd.f32 %v3017_v56, %v2700_v57 }
 0xa67   : > { %v3208_v59 = vpop.f32.mrf.mxu0 }
 0xa68   : > { %v2707_v60 = vmul.f32 0.70710677, %v2701_v58  ;;  %v2706_v18 = vmul.f32 0.5, %v2701_v58 }
 0xa69   : > { %v2703_v61 = vpop.f32.mrf.mxu0 }
 0xa6a   : > { %v2710_v25 = vand.u32 2147483647, %v2707_v60  ;;  %vm2708_vm5 = vcmp.ge.f32.partialorder %v2707_v60, 0.0 }
 0xa6b   : > { %v3209_v63 = vpop.f32.mrf.mxu0  ;;  %v2709_v17 = vsel %vm2708_vm5, 1.0, %v3459_v16 }
 0xa6c   : > { %v2711_v0 = vmul.f32 0.3275911, %v2710_v25  ;;  %v2724_v49 = vsub.f32 0.0, %v2710_v25 }
 0xa6e   : > { %v2712_v1 = vadd.f32 1.0, %v2711_v0  ;;  %v2725_v3 = vmul.f32 %v2724_v49, %v2710_v25 }
 0xa70   : > { %3388 = vrcp.f32 %v2712_v1  ;;  %v2726_v6 = vmul.f32 1.442695, %v2725_v3 }
 0xa72   : > { %3390 = vpow2.f32 %v2726_v6 }
 0xa7d   : > { %v3389_v4 = vpop.eup %3388 }
 0xa7e   : > { %v2715_v5 = vmul.f32 1.0614054, %v3389_v4 }
 0xa7f   : > { %v3391_v62 = vpop.eup %3390 }
 0xa80   : > { %v2716_v7 = vadd.f32 -1.4531521, %v2715_v5 }
 0xa82   : > { %v2717_v8 = vmul.f32 %v3389_v4, %v2716_v7 }
 0xa84   : > { %v2718_v9 = vadd.f32 1.4214138, %v2717_v8 }
 0xa86   : > { %v2719_v27 = vmul.f32 %v3389_v4, %v2718_v9 }
 0xa88   : > { %v2720_v10 = vadd.f32 -0.28449672, %v2719_v27 }
 0xa8a   : > { %v2721_v11 = vmul.f32 %v3389_v4, %v2720_v10 }
 0xa8c   : > { %v2722_v12 = vadd.f32 0.2548296, %v2721_v11 }
 0xa8e   : > { %v2723_v13 = vmul.f32 %v3389_v4, %v2722_v12 }
 0xa90   : > { %v2728_v14 = vmul.f32 %v3391_v62, %v2723_v13 }
 0xa92   : > { %v2729_v15 = vsub.f32 1.0, %v2728_v14 }
 0xa94   : > { %v2730_v2 = vmul.f32 %v2729_v15, %v2709_v17 }
 0xa96   : > { %v2731_v19 = vadd.f32 1.0, %v2730_v2 }
 0xa98   : > { %v2732_v20 = vmul.f32 %v2731_v19, %v2706_v18 }
 0xa9a   : > { %v2733_v21 = vpack.c.bf16 %v2732_v20, %v2732_v20 }
 0xa9c   : > { %3227 = vmatmul.mubr.bf16.vlgmr.msra.gmra.mxu1 %v2733_v21 }
 0xb5c   : > { %v2839_v23 = vpop.f32.mrf.mxu1 }
 0xb5d   : > { %v2840_v24 = vadd.f32 %v3021_v22, %v2839_v23 }
 0xb5e   : > { %v3228_v26 = vpop.f32.mrf.mxu1 }
 0xb5f   : > { %v2845_v29 = vadd.f32 %v2840_v24, %v3948_v28 }
 0xb60   : > { %v2842_v30 = vpop.f32.mrf.mxu1 }
 0xb61   : > { %2846 = vst.msk [vmem:[%s431_s15] sm:$0xff] %vm440_vm0, %v2845_v29 }
 0xb62   : > { %v3229_v31 = vpop.f32.mrf.mxu1 }
 0xb63   : > { %3406 = shalt.err (!%p3403_p3)
}
 0xb64   : > { %s3407_s23 = scalar_lea.hbm %s4011_s27, 128  ;;  %s3411_s15 = scalar_lea.hbm %s4066_s13, 256 }
 0xb65   : > { %p3408_p4 = scmp.ne.s32.totalorder %s4011_s27, %s3407_s23  ;;  %p3412_p9 = scmp.lt.s32.totalorder %s4011_s27, %s4066_s13 }
 0xb66   : > { %p3413_p10 = scmp.lt.s32.totalorder %s3411_s15, %s3407_s23 }
 0xb67   : > { %p3409_p7 = pnand %p3408_p4, %p3569_p5 }
 0xb68   : > { %p3414_p11 = por %p3413_p10, %p3412_p9 }
 0xb69   : > { %p3410_p8 = pneg %p3409_p7 }
 0xb6b   : > { %p3415_p12 = pnand %p3414_p11, %p3410_p8 }
 0xb6d   : > { %3418 = shalt.err (!%p3415_p12)
}
 0xb6e   : > { %3230 = dma.vmem_to_hbm [thread:$0]  (%p3569_p5), %s4013_s16, 128, %s4011_s27, %s2848_s29  }
 0xb6f PF: > { %p3236_p13 = scmp.ge.s32.totalorder %s3453_s28, 2  ;;  %s2873_s21 = sand.u32 1, %s3441_s25  }
 0xb70   : > { %s2874_s0 = scalar_lea.sflag [#allocation4], %s2873_s21 }
 0xb71   : > { %p3233_p0 = pnand %p3236_p13, %p3573_p6 }
 0xb73   : > { %p3234_p1 = pneg %p3233_p0 }
 0xb75   : > { %3436 = dma.done.wait (%p3234_p1), %s2874_s0, 128  }
 0xb76   : > { %3438 = vsyncadd (%p3234_p1), %s2874_s0, 4294967168  ;;  %s4079_s22 = sld [smem:[#allocation6_spill]]  ;;  %p23_p2 = scmp.ge.s32.totalorder %s3556_s14, 4  }
 0xb77   : > { %s4080_s27 = sld [smem:[#allocation7_spill]]  ;;  %s4081_s25 = smov %s3445_s26 }
 0xb78   : > { %s4083_s28 = smov %s3556_s14  ;;  %25 = sbr.rel (!%p23_p2) target bundleno = 6 (0x6), region = 107 }
 0xb7c   : > { %s4082_s26 = smov %s4079_s22 }
 0xb7d   :  { %2879 = vsyncpa [#allocation4], 1 }
 0xb7e   :  { %2881 = vsyncpa [#allocation4 + $0x1], 1 }

</bundles_post_ra>
